<compile_context>
chip_gen: v6e
topology: v6e:2x2x1
jax: 0.10.0
libtpu: 0.0.40
codegen_flags: <defaults>
</compile_context>

<pallas_src>
import functools

import jax
import jax.numpy as jnp
from jax import lax
from jax.experimental import pallas as pl
from jax.experimental.pallas import tpu as pltpu


def _mtl_kernel(x_ref, wbT_ref, bb_ref, whT_ref, bh_ref, out_ref,
                *, hw, tile_hw, need_mask):
    # x_ref  : (1, Cin, TH) bf16  one image slab, HW tile on the lane axis
    # wbT_ref: (FD, Cin)    bf16  synthetic backbone 1x1-conv weight (transposed)
    # bb_ref : (FD, 1)      f32   backbone bias (per sublane)
    # whT_ref: (HP, FD)     bf16  both heads fused + sublane-padded (transposed)
    # bh_ref : (HP, 1)      f32   fused head bias
    # out_ref: (1, HP, 1)   f32   per-image pooled head sums (resident over k)
    k = pl.program_id(1)

    @pl.when(k == 0)
    def _():
        out_ref[...] = jnp.zeros_like(out_ref)

    x = x_ref[0]                                                 # (Cin, TH) bf16

    # synthetic base_model.features: 1x1 conv + ReLU (bf16 MXU, f32 epilogue)
    feats = jnp.dot(wbT_ref[...], x, preferred_element_type=jnp.float32)
    feats = jnp.maximum(feats + bb_ref[...], 0.0)                # (FD, TH) f32

    # fused heads: Dropout(eval)=identity, 1x1 conv + bias, ReLU
    y = jnp.dot(whT_ref[...], feats.astype(jnp.bfloat16),
                preferred_element_type=jnp.float32)              # (HP, TH) f32
    y = jnp.maximum(y + bh_ref[...], 0.0)

    if need_mask:  # partial last HW tile: zero columns past HW before pooling
        col = k * tile_hw + lax.broadcasted_iota(jnp.int32, y.shape, 1)
        y = jnp.where(col < hw, y, 0.0)

    # AdaptiveAvgPool2d((1,1)) + flatten: accumulate the HW sum per head row.
    out_ref[...] += jnp.sum(y, axis=1, keepdims=True)[None]      # (1, HP, 1)

    @pl.when(k == pl.num_programs(1) - 1)
    def _():
        out_ref[...] *= (1.0 / hw)                               # sum -> mean


def prepare_params(params):
    """One-time packing of weights for the kernel (call once, reuse every step)."""
    w1, w2 = params['w1'], params['w2']            # (FD, nc) each
    b1, b2 = params['b1'], params['b2']            # (1, nc)
    feat_dim, nc = w1.shape
    hp = max(8, ((2 * nc + 7) // 8) * 8)           # fused heads, sublane-padded

    whT = jnp.zeros((hp, feat_dim), jnp.float32)
    whT = whT.at[:nc].set(w1.T).at[nc:2 * nc].set(w2.T)
    bhT = jnp.zeros((hp, 1), jnp.float32)
    bhT = bhT.at[:nc, 0].set(b1[0]).at[nc:2 * nc, 0].set(b2[0])

    return dict(
        wbT=jnp.transpose(params['wb']).astype(jnp.bfloat16),    # (FD, Cin)
        bb=jnp.transpose(params['bb']),                          # (FD, 1) f32
        whT=whT.astype(jnp.bfloat16),                            # (HP, FD)
        bhT=bhT,                                                 # (HP, 1) f32
    )


def mtl_forward(x_nchw, packed, num_classes):
    """x_nchw: (N, Cin, H, W) f32. Returns (out1, out2), each (N, num_classes)."""
    N, C, H, W = x_nchw.shape
    HW = H * W
    feat_dim = packed['wbT'].shape[0]
    hp = packed['whT'].shape[0]
    nc = num_classes

    # NCHW -> (N, Cin, HW): a pure reshape (no HBM transpose); HW rides the lanes.
    x = x_nchw.reshape(N, C, HW).astype(jnp.bfloat16)

    # HW tiling: fat lane tiles amortize per-step overhead; the cap keeps the
    # f32 (feat_dim, TH) intermediate at a few MiB (fits v7x's 64 MiB VMEM/TC).
    max_tile = 2048
    if HW <= max_tile:
        tile_hw, kt, need_mask = HW, 1, False
    else:
        tile_hw = max_tile
        kt = pl.cdiv(HW, tile_hw)
        need_mask = (HW % tile_hw) != 0

    kernel = functools.partial(_mtl_kernel, hw=HW, tile_hw=tile_hw,
                               need_mask=need_mask)

    # VMEM: x double-buffered, weights single-buffered (constant index maps),
    # out double-buffered, plus the f32 intermediates and headroom.
    est = (2 * C * tile_hw * 2                       # x tile, bf16, 2 buffers
           + feat_dim * tile_hw * 4                  # feats f32
           + hp * tile_hw * 4                        # fused head activations f32
           + feat_dim * C * 2 + hp * feat_dim * 2    # bf16 weights (1 buffer)
           + (feat_dim + hp) * 4                     # biases f32
           + 2 * hp * 4                              # out, 2 buffers
           + (4 << 20))                              # headroom
    vmem_limit = int(min(64 << 20, max(8 << 20, est)))

    resident = dict(pipeline_mode=pl.Buffered(1))    # constant blocks: 1 buffer

    out = pl.pallas_call(
        kernel,
        grid=(N, kt),                                # images x HW tiles
        in_specs=[
            pl.BlockSpec((1, C, tile_hw), lambda i, k: (i, 0, k)),   # streamed x
            pl.BlockSpec((feat_dim, C), lambda i, k: (0, 0), **resident),
            pl.BlockSpec((feat_dim, 1), lambda i, k: (0, 0), **resident),
            pl.BlockSpec((hp, feat_dim), lambda i, k: (0, 0), **resident),
            pl.BlockSpec((hp, 1), lambda i, k: (0, 0), **resident),
        ],
        out_specs=pl.BlockSpec((1, hp, 1), lambda i, k: (i, 0, 0)),
        out_shape=jax.ShapeDtypeStruct((N, hp, 1), jnp.float32),
        compiler_params=pltpu.CompilerParams(
            dimension_semantics=("parallel", "arbitrary"),
            vmem_limit_bytes=vmem_limit),
    )(x, packed['wbT'], packed['bb'], packed['whT'], packed['bhT'])

    out = out[:, :, 0]                               # (N, hp)
    return out[:, :nc], out[:, nc:2 * nc]


def init_params(key, c_in, num_classes, feat_dim=512):
    ks = jax.random.split(key, 6)
    # deterministic small-scale init (stand-in for PyTorch kaiming-uniform)
    wb = jax.random.normal(ks[0], (c_in, feat_dim), jnp.float32) * (1.0 / jnp.sqrt(c_in))
    bb = jax.random.normal(ks[1], (1, feat_dim), jnp.float32) * 0.01
    w1 = jax.random.normal(ks[2], (feat_dim, num_classes), jnp.float32) * (1.0 / jnp.sqrt(feat_dim))
    b1 = jax.random.normal(ks[3], (1, num_classes), jnp.float32) * 0.01
    w2 = jax.random.normal(ks[4], (feat_dim, num_classes), jnp.float32) * (1.0 / jnp.sqrt(feat_dim))
    b2 = jax.random.normal(ks[5], (1, num_classes), jnp.float32) * 0.01
    return dict(wb=wb, bb=bb, w1=w1, b1=b1, w2=w2, b2=b2)


def _reference(x_nchw, params):
    """Pure-JAX reference of the same forward (bf16 matmuls, f32 accumulate)."""
    N, C, H, W = x_nchw.shape
    x = x_nchw.reshape(N, C, H * W).astype(jnp.bfloat16)         # (N, C, HW)
    wbT = jnp.transpose(params['wb']).astype(jnp.bfloat16)       # (FD, C)
    feats = jnp.einsum('fc,nch->nfh', wbT, x, preferred_element_type=jnp.float32)
    feats = jnp.maximum(feats + params['bb'].T[None], 0.0)       # (N, FD, HW)

    def head(w, b):
        y = jnp.einsum('kf,nfh->nkh', w.T.astype(jnp.bfloat16),
                       feats.astype(jnp.bfloat16),
                       preferred_element_type=jnp.float32)
        y = jnp.maximum(y + b.T[None], 0.0)
        return jnp.mean(y, axis=-1)                              # (N, nc)

    return head(params['w1'], params['b1']), head(params['w2'], params['b2'])


if __name__ == "__main__":
    key = jax.random.PRNGKey(0)
    k_x, k_p = jax.random.split(key)

    N, C_IN, H, W = 2, 4, 16, 16
    NUM_CLASSES = 10

    x = jax.random.normal(k_x, (N, C_IN, H, W), jnp.float32)
    params = init_params(k_p, C_IN, NUM_CLASSES)
    packed = prepare_params(params)          # one-time weight packing

    out1, out2 = mtl_forward(x, packed, NUM_CLASSES)
    out1, out2 = jax.block_until_ready(out1), jax.block_until_ready(out2)

    ref1, ref2 = _reference(x, params)
    assert out1.shape == (N, NUM_CLASSES) and out2.shape == (N, NUM_CLASSES)
    assert jnp.allclose(out1, ref1, atol=2e-2, rtol=2e-2), float(jnp.max(jnp.abs(out1 - ref1)))
    assert jnp.allclose(out2, ref2, atol=2e-2, rtol=2e-2), float(jnp.max(jnp.abs(out2 - ref2)))

    print("KERNEL_OK")
</pallas_src>

<mosaic_0001>
module attributes {stable_mosaic.version = 11 : i64} {
  func.func @_mtl_kernel(%arg0: i32, %arg1: i32, %arg2: memref<1x4x256xbf16, #tpu.memory_space<vmem>>, %arg3: memref<512x4xbf16, #tpu.memory_space<vmem>>, %arg4: memref<512x1xf32, #tpu.memory_space<vmem>>, %arg5: memref<24x512xbf16, #tpu.memory_space<vmem>>, %arg6: memref<24x1xf32, #tpu.memory_space<vmem>>, %arg7: memref<1x24x1xf32, #tpu.memory_space<vmem>>) attributes {dimension_semantics = [#tpu.dimension_semantics<parallel>, #tpu.dimension_semantics<arbitrary>], iteration_bounds = array<i64: 2, 1>, scalar_prefetch = 0 : i64, scratch_operands = 0 : i64, tpu.core_type = #tpu.core_type<tc>, window_params = [{transform_indices = @transform_0, window_bounds = array<i64: 1, 4, 256>}, {pipeline_mode = #tpu.pipeline_mode<synchronous>, transform_indices = @transform_1, window_bounds = array<i64: 512, 4>}, {pipeline_mode = #tpu.pipeline_mode<synchronous>, transform_indices = @transform_2, window_bounds = array<i64: 512, 1>}, {pipeline_mode = #tpu.pipeline_mode<synchronous>, transform_indices = @transform_3, window_bounds = array<i64: 24, 512>}, {pipeline_mode = #tpu.pipeline_mode<synchronous>, transform_indices = @transform_4, window_bounds = array<i64: 24, 1>}, {transform_indices = @transform_5, window_bounds = array<i64: 1, 24, 1>}]} {
    %c0_i32 = arith.constant 0 : i32
    %0 = arith.cmpi eq, %arg1, %c0_i32 : i32
    %1 = arith.extui %0 : i1 to i32
    %c0_i32_0 = arith.constant 0 : i32
    %2 = arith.cmpi ne, %1, %c0_i32_0 : i32
    scf.if %2 {
      %cst_23 = arith.constant 0.000000e+00 : f32
      %29 = vector.broadcast %cst_23 : f32 to vector<1x24x1xf32>
      %c0_24 = arith.constant 0 : index
      %c0_25 = arith.constant 0 : index
      %c0_26 = arith.constant 0 : index
      %30 = vector.load %arg7[%c0_24, %c0_25, %c0_26] : memref<1x24x1xf32, #tpu.memory_space<vmem>>, vector<1x24x1xf32>
      tpu.vector_store %arg7[%c0_24, %c0_25, %c0_26], %29 {strides = array<i32>} : memref<1x24x1xf32, #tpu.memory_space<vmem>>, vector<1x24x1xf32>,
    } else {
    }
    %c0 = arith.constant 0 : index
    %c0_1 = arith.constant 0 : index
    %c0_2 = arith.constant 0 : index
    %3 = vector.load %arg2[%c0, %c0_1, %c0_2] : memref<1x4x256xbf16, #tpu.memory_space<vmem>>, vector<1x4x256xbf16>
    %4 = vector.shape_cast %3 : vector<1x4x256xbf16> to vector<4x256xbf16>
    %c0_3 = arith.constant 0 : index
    %c0_4 = arith.constant 0 : index
    %5 = vector.load %arg3[%c0_3, %c0_4] : memref<512x4xbf16, #tpu.memory_space<vmem>>, vector<512x4xbf16>
    %cst = arith.constant dense<0.000000e+00> : vector<512x256xf32>
    %6 = tpu.matmul %5, %4, %cst {dimension_numbers = #tpu.dot_dimension_numbers<[1], [0], [0], [1], [0, 0, 1, 1], [], []>} : vector<512x4xbf16>, vector<4x256xbf16>, vector<512x256xf32> -> vector<512x256xf32>
    %c0_5 = arith.constant 0 : index
    %c0_6 = arith.constant 0 : index
    %7 = vector.load %arg4[%c0_5, %c0_6] : memref<512x1xf32, #tpu.memory_space<vmem>>, vector<512x1xf32>
    %8 = vector.broadcast %7 : vector<512x1xf32> to vector<512x256xf32>
    %9 = arith.addf %6, %8 : vector<512x256xf32>
    %cst_7 = arith.constant 0.000000e+00 : f32
    %10 = vector.broadcast %cst_7 : f32 to vector<512x256xf32>
    %11 = arith.maximumf %9, %10 : vector<512x256xf32>
    %c0_8 = arith.constant 0 : index
    %c0_9 = arith.constant 0 : index
    %12 = vector.load %arg5[%c0_8, %c0_9] : memref<24x512xbf16, #tpu.memory_space<vmem>>, vector<24x512xbf16>
    %13 = arith.truncf %11 : vector<512x256xf32> to vector<512x256xbf16>
    %cst_10 = arith.constant dense<0.000000e+00> : vector<24x256xf32>
    %14 = tpu.matmul %12, %13, %cst_10 {dimension_numbers = #tpu.dot_dimension_numbers<[1], [0], [0], [1], [0, 0, 1, 1], [], []>} : vector<24x512xbf16>, vector<512x256xbf16>, vector<24x256xf32> -> vector<24x256xf32>
    %c0_11 = arith.constant 0 : index
    %c0_12 = arith.constant 0 : index
    %15 = vector.load %arg6[%c0_11, %c0_12] : memref<24x1xf32, #tpu.memory_space<vmem>>, vector<24x1xf32>
    %16 = vector.broadcast %15 : vector<24x1xf32> to vector<24x256xf32>
    %17 = arith.addf %14, %16 : vector<24x256xf32>
    %cst_13 = arith.constant 0.000000e+00 : f32
    %18 = vector.broadcast %cst_13 : f32 to vector<24x256xf32>
    %19 = arith.maximumf %17, %18 : vector<24x256xf32>
    %c0_14 = arith.constant 0 : index
    %c0_15 = arith.constant 0 : index
    %c0_16 = arith.constant 0 : index
    %20 = vector.load %arg7[%c0_14, %c0_15, %c0_16] : memref<1x24x1xf32, #tpu.memory_space<vmem>>, vector<1x24x1xf32>
    %cst_17 = arith.constant dense<0.000000e+00> : vector<24xf32>
    %21 = vector.multi_reduction <add>, %19, %cst_17 [1] : vector<24x256xf32> to vector<24xf32>
    %22 = vector.shape_cast %21 : vector<24xf32> to vector<24x1xf32>
    %23 = vector.shape_cast %22 : vector<24x1xf32> to vector<1x24x1xf32>
    %24 = arith.addf %20, %23 : vector<1x24x1xf32>
    %c0_18 = arith.constant 0 : index
    %c0_19 = arith.constant 0 : index
    %c0_20 = arith.constant 0 : index
    %25 = vector.load %arg7[%c0_18, %c0_19, %c0_20] : memref<1x24x1xf32, #tpu.memory_space<vmem>>, vector<1x24x1xf32>
    tpu.vector_store %arg7[%c0_18, %c0_19, %c0_20], %24 {strides = array<i32>} : memref<1x24x1xf32, #tpu.memory_space<vmem>>, vector<1x24x1xf32>,
    %c0_i32_21 = arith.constant 0 : i32
    %26 = arith.cmpi eq, %arg1, %c0_i32_21 : i32
    %27 = arith.extui %26 : i1 to i32
    %c0_i32_22 = arith.constant 0 : i32
    %28 = arith.cmpi ne, %27, %c0_i32_22 : i32
    scf.if %28 {
      %c0_23 = arith.constant 0 : index
      %c0_24 = arith.constant 0 : index
      %c0_25 = arith.constant 0 : index
      %29 = vector.load %arg7[%c0_23, %c0_24, %c0_25] : memref<1x24x1xf32, #tpu.memory_space<vmem>>, vector<1x24x1xf32>
      %cst_26 = arith.constant 3.906250e-03 : f32
      %30 = vector.broadcast %cst_26 : f32 to vector<1x24x1xf32>
      %31 = arith.mulf %29, %30 : vector<1x24x1xf32>
      %c0_27 = arith.constant 0 : index
      %c0_28 = arith.constant 0 : index
      %c0_29 = arith.constant 0 : index
      %32 = vector.load %arg7[%c0_27, %c0_28, %c0_29] : memref<1x24x1xf32, #tpu.memory_space<vmem>>, vector<1x24x1xf32>
      tpu.vector_store %arg7[%c0_27, %c0_28, %c0_29], %31 {strides = array<i32>} : memref<1x24x1xf32, #tpu.memory_space<vmem>>, vector<1x24x1xf32>,
    } else {
    }
    return
  }
  func.func @transform_0(%arg0: i32, %arg1: i32) -> (i32, i32, i32) {
    %c0_i32 = arith.constant 0 : i32
    %c0_i32_0 = arith.constant 0 : i32
    return %arg0, %c0_i32, %arg1 : i32, i32, i32
  }
  func.func @transform_1(%arg0: i32, %arg1: i32) -> (i32, i32) {
    %c0_i32 = arith.constant 0 : i32
    %c0_i32_0 = arith.constant 0 : i32
    %c0_i32_1 = arith.constant 0 : i32
    return %c0_i32, %c0_i32_0 : i32, i32
  }
  func.func @transform_2(%arg0: i32, %arg1: i32) -> (i32, i32) {
    %c0_i32 = arith.constant 0 : i32
    %c0_i32_0 = arith.constant 0 : i32
    %c0_i32_1 = arith.constant 0 : i32
    return %c0_i32, %c0_i32_0 : i32, i32
  }
  func.func @transform_3(%arg0: i32, %arg1: i32) -> (i32, i32) {
    %c0_i32 = arith.constant 0 : i32
    %c0_i32_0 = arith.constant 0 : i32
    %c0_i32_1 = arith.constant 0 : i32
    return %c0_i32, %c0_i32_0 : i32, i32
  }
  func.func @transform_4(%arg0: i32, %arg1: i32) -> (i32, i32) {
    %c0_i32 = arith.constant 0 : i32
    %c0_i32_0 = arith.constant 0 : i32
    %c0_i32_1 = arith.constant 0 : i32
    return %c0_i32, %c0_i32_0 : i32, i32
  }
  func.func @transform_5(%arg0: i32, %arg1: i32) -> (i32, i32, i32) {
    %c0_i32 = arith.constant 0 : i32
    %c0_i32_0 = arith.constant 0 : i32
    %c0_i32_1 = arith.constant 0 : i32
    return %arg0, %c0_i32, %c0_i32_0 : i32, i32, i32
  }
}

</mosaic_0001>

<bundles_post_ra>
// kernel: tpu_custom_call.1
= control target key start
LH: loop header
LB: loop body
LE: loop exit
PB: predicated region body
PF: predicated region fallthrough
CT: control target
= control target key end

     0   :  { %s2009_s18 = smov 0   ;;  %s2011_s19 = smov 0   ;;  %s2919_s0 = inlined_call_operand.vmem [shape: bf16[2,4,256], index: 0, kind: input, shape index: {}]   ;;  %s2920_s1 = inlined_call_operand.vmem [shape: bf16[512,4], index: 1, kind: input, shape index: {}]   ;;  %s2921_s2 = inlined_call_operand.vmem [shape: f32[512,1], index: 2, kind: input, shape index: {}]   ;;  %s2922_s3 = inlined_call_operand.vmem [shape: bf16[24,512], index: 3, kind: input, shape index: {}]   ;;  %s2923_s4 = inlined_call_operand.vmem [shape: f32[24,1], index: 4, kind: input, shape index: {}]   ;;  %s2924_s5 = inlined_call_operand.vmem [shape: f32[2,24,1], index: 5, kind: output, shape index: {}]  }
   0x1   :  { %s2013_s20 = smov 0  }
   0x2 LB: > { %s27_s21 = sadd.s32 1, %s1971_s19  ;;  %p1799_p0 = scmp.ge.s32.totalorder %s1975_s20, 1  ;;  %s1975_s20 = sphi %s2013_s20, %s15_s20   ;;  %s1971_s19 = sphi %s2011_s19, %s3088_s19   ;;  %s1967_s18 = sphi %s2009_s18, %s3087_s18  }
   0x3   : > { %p29_p1 = scmp.ge.s32.totalorder %s27_s21, 2  ;;  %p206_p2 = scmp.lt.s32.totalorder %s1975_s20, 3 }
   0x5   : > { %s3090_s21 = smov (%p29_p1, %s27_s21), 0  ;;  %p207_p3 = pnand %p1799_p0, %p206_p2 }
   0x7   : > { %210 = sbr.rel (%p207_p3) target bundleno = 805 (0x325), region = 40 }
   0xc   : > { %p239_p4 = scmp.lt.s32.totalorder %s1967_s18, 1  ;;  %v1977_v0 = vmov 0   ;;  %vm977_vm0 = vcmask 1041408   ;;  %v341_v1 = vld [vmem:[%s2921_s2 + $0x70] sm:$0xff]  ;;  %v1911_v5 = vld [vmem:[%s2920_s1] sm:$0xff]   ;;  %v342_v7 = vld [vmem:[%s2921_s2 + $0x78] sm:$0xff] }
   0xd   : > { %1016 = vmatprep.mubr.bf16.mxu0 %v1977_v0  ;;  %1226 = vmatprep.mubr.bf16.mxu1 %v1977_v0  ;;  %v339_v6 = vld [vmem:[%s2921_s2 + $0x60] sm:$0xff]  ;;  %v1912_v8 = vld [vmem:[%s2920_s1 + $0xa8] sm:$0xff]   ;;  %vm880_vm1 = vcmask 31744   ;;  %v337_v10 = vld [vmem:[%s2921_s2 + $0x50] sm:$0xff]  ;;  %vm258_vm2 = vcmask 7168  }
   0xe   : > { %s3092_s18 = smov (!%p239_p4, %s1967_s18), 1  ;;  %1909 = vset.pattern.permute.xlu0 %v1977_v0  ;;  %1910 = vset.pattern.permute.xlu1 %v1977_v0  ;;  %v340_v9 = vld [vmem:[%s2921_s2 + $0x68] sm:$0xff]  ;;  %v338_v11 = vld [vmem:[%s2921_s2 + $0x58] sm:$0xff]  ;;  %v335_v12 = vld [vmem:[%s2921_s2 + $0x40] sm:$0xff] }
   0xf   : > { %s1879_s22 = sshll.u32 %s3092_s18, 2  ;;  %463 = vperm.xlu0 %1909, %v341_v1   ;;  %453 = vperm.xlu1 %1910, %v339_v6   ;;  %v1913_v13 = vld [vmem:[%s2920_s1 + $0x8] sm:$0xff]   ;;  %v1914_v14 = vld [vmem:[%s2920_s1 + $0xb0] sm:$0xff]   ;;  %v334_v17 = vld [vmem:[%s2921_s2 + $0x38] sm:$0xff]  ;;  %s1882_s26 = smul.u32 24, %s3092_s18 }
  0x10   : > { %s246_s27 = scalar_lea.vmem %s2919_s0, %s1879_s22  ;;  %v336_v15 = vld [vmem:[%s2921_s2 + $0x48] sm:$0xff]  ;;  %v333_v16 = vld [vmem:[%s2921_s2 + $0x30] sm:$0xff]  ;;  %v1916_v19 = vld [vmem:[%s2920_s1 + $0xb8] sm:$0xff]  }
  0x11   : > { %v1835_v2 = vld.sshfl [vmem:[%s246_s27] sm:$0x33 pattern:$0x76325410]  ;;  %v1915_v18 = vld [vmem:[%s2920_s1 + $0x10] sm:$0xff]   ;;  %v332_v21 = vld [vmem:[%s2921_s2 + $0x28] sm:$0xff]  ;;  %s2884_s29 = scalar_lea.vmem %s2924_s5, %s1882_s26 }
  0x12   : > { %v879_v3 = vcombine.high %v1835_v2, %v1835_v2  ;;  %v979_v4 = vsel %vm977_vm0, %v1835_v2, 0  ;;  %v331_v20 = vld [vmem:[%s2921_s2 + $0x20] sm:$0xff]  ;;  %v329_v22 = vld [vmem:[%s2921_s2 + $0x10] sm:$0xff]  ;;  %v330_v23 = vld [vmem:[%s2921_s2 + $0x18] sm:$0xff] }
  0x13   : > { %468 = vperm.xlu0 %1909, %v342_v7   ;;  %458 = vperm.xlu1 %1910, %v340_v9   ;;  %v1917_v24 = vld [vmem:[%s2920_s1 + $0x18] sm:$0xff]   ;;  %v327_v25 = vld [vmem:[%s2921_s2] sm:$0xff]  ;;  %v328_v27 = vld [vmem:[%s2921_s2 + $0x8] sm:$0xff] }
  0x14   : > { %1836 = vmatprep.subr.msk.bf16.mxu0 %vm977_vm0, %v879_v3  ;;  %1880 = vmatprep.subr.msk.bf16.mxu1 %vm977_vm0, %v879_v3  ;;  %v1918_v26 = vld [vmem:[%s2920_s1 + $0xc0] sm:$0xff]   ;;  %v357_v28 = vld [vmem:[%s2921_s2 + $0xf0] sm:$0xff]  ;;  %v358_v29 = vld [vmem:[%s2921_s2 + $0xf8] sm:$0xff] }
  0x15   : > { %999 = vmatpush1.bf16.msra.mxu0 %v979_v4  ;;  %1881 = vmatpush1.bf16.msra.mxu1 %v979_v4  ;;  %v355_v30 = vld [vmem:[%s2921_s2 + $0xe0] sm:$0xff]  ;;  %v1920_v32 = vld [vmem:[%s2920_s1 + $0xc8] sm:$0xff]   ;;  %v353_v34 = vld [vmem:[%s2921_s2 + $0xd0] sm:$0xff] }
  0x16   : > { %v1919_v31 = vld [vmem:[%s2920_s1 + $0x20] sm:$0xff]   ;;  %v356_v33 = vld [vmem:[%s2921_s2 + $0xe8] sm:$0xff]  ;;  %v354_v35 = vld [vmem:[%s2921_s2 + $0xd8] sm:$0xff] }
  0x17   : > { %443 = vperm.xlu0 %1909, %v337_v10   ;;  %448 = vperm.xlu1 %1910, %v338_v11   ;;  %v1921_v36 = vld [vmem:[%s2920_s1 + $0x28] sm:$0xff]   ;;  %v1922_v37 = vld [vmem:[%s2920_s1 + $0xd0] sm:$0xff]   ;;  %v351_v38 = vld [vmem:[%s2921_s2 + $0xc0] sm:$0xff] }
  0x18   : > { %1837 = vmatmul.mubr.msk.bf16.vlgmr.msra.gmra.mxu0 %vm880_vm1, %v1911_v5  ;;  %1858 = vmatmul.mubr.msk.bf16.vlgmr.msra.gmra.mxu1 %vm880_vm1, %v1912_v8  ;;  %v352_v39 = vld [vmem:[%s2921_s2 + $0xc8] sm:$0xff]  ;;  %v349_v40 = vld [vmem:[%s2921_s2 + $0xb0] sm:$0xff]  ;;  %v350_v41 = vld [vmem:[%s2921_s2 + $0xb8] sm:$0xff] }
  0x19   : > { %1026 = vmatprep.mubr.bf16.mxu0 %v1977_v0  ;;  %1236 = vmatprep.mubr.bf16.mxu1 %v1977_v0  ;;  %v347_v42 = vld [vmem:[%s2921_s2 + $0xa0] sm:$0xff]  ;;  %v1923_v43 = vld [vmem:[%s2920_s1 + $0x30] sm:$0xff]   ;;  %v1924_v44 = vld [vmem:[%s2920_s1 + $0xd8] sm:$0xff]  }
  0x1a   : > { %v348_v45 = vld [vmem:[%s2921_s2 + $0xa8] sm:$0xff]  ;;  %v345_v46 = vld [vmem:[%s2921_s2 + $0x90] sm:$0xff]  ;;  %v346_v47 = vld [vmem:[%s2921_s2 + $0x98] sm:$0xff] }
  0x1b   : > { %433 = vperm.xlu0 %1909, %v335_v12   ;;  %438 = vperm.xlu1 %1910, %v336_v15   ;;  %v343_v48 = vld [vmem:[%s2921_s2 + $0x80] sm:$0xff]  ;;  %v1925_v49 = vld [vmem:[%s2920_s1 + $0x38] sm:$0xff]   ;;  %v344_v51 = vld [vmem:[%s2921_s2 + $0x88] sm:$0xff] }
  0x1c   : > { %v1926_v50 = vld [vmem:[%s2920_s1 + $0xe0] sm:$0xff]   ;;  %v373_v52 = vld [vmem:[%s2921_s2 + $0x170] sm:$0xff]  ;;  %v374_v53 = vld [vmem:[%s2921_s2 + $0x178] sm:$0xff] }
  0x1d   : > { %v371_v54 = vld [vmem:[%s2921_s2 + $0x160] sm:$0xff]  ;;  %v1928_v56 = vld [vmem:[%s2920_s1 + $0xe8] sm:$0xff]   ;;  %v369_v58 = vld [vmem:[%s2921_s2 + $0x150] sm:$0xff] }
  0x1e   : > { %v1927_v55 = vld [vmem:[%s2920_s1 + $0x40] sm:$0xff]   ;;  %v372_v57 = vld [vmem:[%s2921_s2 + $0x168] sm:$0xff]  ;;  %v370_v59 = vld [vmem:[%s2921_s2 + $0x158] sm:$0xff] }
  0x1f   : > { %423 = vperm.xlu0 %1909, %v333_v16   ;;  %428 = vperm.xlu1 %1910, %v334_v17   ;;  %v367_v60 = vld [vmem:[%s2921_s2 + $0x140] sm:$0xff]  ;;  %v1929_v61 = vld [vmem:[%s2920_s1 + $0x48] sm:$0xff]   ;;  %v1930_v62 = vld [vmem:[%s2920_s1 + $0xf0] sm:$0xff]  }
  0x20   : > { %1838 = vmatmul.mubr.msk.bf16.gmra.mxu0 %vm880_vm1, %v1913_v13  ;;  %1859 = vmatmul.mubr.msk.bf16.gmra.mxu1 %vm880_vm1, %v1914_v14  ;;  %v368_v63 = vld [vmem:[%s2921_s2 + $0x148] sm:$0xff]  ;;  %v365_v1 = vld [vmem:[%s2921_s2 + $0x130] sm:$0xff]  ;;  %v366_v2 = vld [vmem:[%s2921_s2 + $0x138] sm:$0xff] }
  0x21   : > { %1036 = vmatprep.mubr.bf16.mxu0 %v1977_v0  ;;  %1246 = vmatprep.mubr.bf16.mxu1 %v1977_v0  ;;  %v363_v3 = vld [vmem:[%s2921_s2 + $0x120] sm:$0xff]  ;;  %v1931_v4 = vld [vmem:[%s2920_s1 + $0x50] sm:$0xff]   ;;  %v1932_v5 = vld [vmem:[%s2920_s1 + $0xf8] sm:$0xff]  }
  0x22   : > { %v364_v6 = vld [vmem:[%s2921_s2 + $0x128] sm:$0xff]  ;;  %v361_v7 = vld [vmem:[%s2921_s2 + $0x110] sm:$0xff]  ;;  %v362_v8 = vld [vmem:[%s2921_s2 + $0x118] sm:$0xff] }
  0x23   : > { %413 = vperm.xlu0 %1909, %v331_v20   ;;  %418 = vperm.xlu1 %1910, %v332_v21   ;;  %v359_v9 = vld [vmem:[%s2921_s2 + $0x100] sm:$0xff]  ;;  %v1933_v10 = vld [vmem:[%s2920_s1 + $0x58] sm:$0xff]   ;;  %v360_v11 = vld [vmem:[%s2921_s2 + $0x108] sm:$0xff] }
  0x24   : > { %v389_v12 = vld [vmem:[%s2921_s2 + $0x1f0] sm:$0xff]  ;;  %v390_v13 = vld [vmem:[%s2921_s2 + $0x1f8] sm:$0xff]  ;;  %v387_v14 = vld [vmem:[%s2921_s2 + $0x1e0] sm:$0xff] }
  0x25   : > { %v1934_v15 = vld [vmem:[%s2920_s1 + $0x60] sm:$0xff]   ;;  %v388_v16 = vld [vmem:[%s2921_s2 + $0x1e8] sm:$0xff]  ;;  %v385_v17 = vld [vmem:[%s2921_s2 + $0x1d0] sm:$0xff] }
  0x26   : > { %v1935_v20 = vld [vmem:[%s2920_s1 + $0x68] sm:$0xff]  }
  0x27   : > { %403 = vperm.xlu0 %1909, %v329_v22   ;;  %408 = vperm.xlu1 %1910, %v330_v23   ;;  %v384_v21 = vld [vmem:[%s2921_s2 + $0x1c8] sm:$0xff]  ;;  %v381_v22 = vld [vmem:[%s2921_s2 + $0x1b0] sm:$0xff]  ;;  %v382_v23 = vld [vmem:[%s2921_s2 + $0x1b8] sm:$0xff] }
  0x28   : > { %1839 = vmatmul.mubr.msk.bf16.gmra.mxu0 %vm880_vm1, %v1915_v18  ;;  %1860 = vmatmul.mubr.msk.bf16.gmra.mxu1 %vm880_vm1, %v1916_v19  ;;  %v386_v18 = vld [vmem:[%s2921_s2 + $0x1d8] sm:$0xff]  ;;  %v383_v19 = vld [vmem:[%s2921_s2 + $0x1c0] sm:$0xff] }
  0x29   : > { %1046 = vmatprep.mubr.bf16.mxu0 %v1977_v0  ;;  %1256 = vmatprep.mubr.bf16.mxu1 %v1977_v0 }
  0x2b   : > { %393 = vperm.xlu0 %1909, %v327_v25   ;;  %398 = vperm.xlu1 %1910, %v328_v27   ;;  %v1936_v25 = vld [vmem:[%s2920_s1 + $0x70] sm:$0xff]  }
  0x2c   : > { %v377_v27 = vld [vmem:[%s2921_s2 + $0x190] sm:$0xff] }
  0x2f   : > { %543 = vperm.xlu0 %1909, %v357_v28   ;;  %548 = vperm.xlu1 %1910, %v358_v29   ;;  %v378_v28 = vld [vmem:[%s2921_s2 + $0x198] sm:$0xff] }
  0x30   : > { %1840 = vmatmul.mubr.msk.bf16.gmra.mxu0 %vm880_vm1, %v1917_v24  ;;  %1861 = vmatmul.mubr.msk.bf16.gmra.mxu1 %vm880_vm1, %v1918_v26  ;;  %v379_v24 = vld [vmem:[%s2921_s2 + $0x1a0] sm:$0xff]  ;;  %v380_v26 = vld [vmem:[%s2921_s2 + $0x1a8] sm:$0xff] }
  0x31   : > { %1056 = vmatprep.mubr.bf16.mxu0 %v1977_v0  ;;  %1266 = vmatprep.mubr.bf16.mxu1 %v1977_v0 }
  0x33   : > { %533 = vperm.xlu0 %1909, %v355_v30   ;;  %538 = vperm.xlu1 %1910, %v356_v33   ;;  %v375_v30 = vld [vmem:[%s2921_s2 + $0x180] sm:$0xff] }
  0x37   : > { %523 = vperm.xlu0 %1909, %v353_v34   ;;  %528 = vperm.xlu1 %1910, %v354_v35   ;;  %v1535_v34 = vld [vmem:[%s2923_s4] sm:$0xff]  ;;  %v1536_v35 = vld [vmem:[%s2923_s4 + $0x8] sm:$0xff] }
  0x38   : > { %1841 = vmatmul.mubr.msk.bf16.gmra.mxu0 %vm880_vm1, %v1919_v31  ;;  %1862 = vmatmul.mubr.msk.bf16.gmra.mxu1 %vm880_vm1, %v1920_v32  ;;  %v1937_v31 = vld [vmem:[%s2920_s1 + $0x78] sm:$0xff]   ;;  %v376_v32 = vld [vmem:[%s2921_s2 + $0x188] sm:$0xff] }
  0x39   : > { %1066 = vmatprep.mubr.bf16.mxu0 %v1977_v0  ;;  %1276 = vmatprep.mubr.bf16.mxu1 %v1977_v0 }
  0x3b   : > { %513 = vperm.xlu0 %1909, %v351_v38   ;;  %518 = vperm.xlu1 %1910, %v352_v39   ;;  %v1537_v38 = vld [vmem:[%s2923_s4 + $0x10] sm:$0xff]  ;;  %v1938_v39 = vld [vmem:[%s2920_s1 + $0x80] sm:$0xff]  }
  0x3f   : > { %503 = vperm.xlu0 %1909, %v349_v40   ;;  %508 = vperm.xlu1 %1910, %v350_v41  }
  0x40   : > { %1842 = vmatmul.mubr.msk.bf16.gmra.mxu0 %vm880_vm1, %v1921_v36  ;;  %1863 = vmatmul.mubr.msk.bf16.gmra.mxu1 %vm880_vm1, %v1922_v37 }
  0x41   : > { %1076 = vmatprep.mubr.bf16.mxu0 %v1977_v0  ;;  %1286 = vmatprep.mubr.bf16.mxu1 %v1977_v0 }
  0x43   : > { %493 = vperm.xlu0 %1909, %v347_v42   ;;  %498 = vperm.xlu1 %1910, %v348_v45  }
  0x47   : > { %483 = vperm.xlu0 %1909, %v345_v46   ;;  %488 = vperm.xlu1 %1910, %v346_v47  }
  0x48   : > { %1843 = vmatmul.mubr.msk.bf16.gmra.mxu0 %vm880_vm1, %v1923_v43  ;;  %1864 = vmatmul.mubr.msk.bf16.gmra.mxu1 %vm880_vm1, %v1924_v44  ;;  %v1939_v44 = vld [vmem:[%s2920_s1 + $0x88] sm:$0xff]  }
  0x49   : > { %1086 = vmatprep.mubr.bf16.mxu0 %v1977_v0  ;;  %1296 = vmatprep.mubr.bf16.mxu1 %v1977_v0 }
  0x4b   : > { %473 = vperm.xlu0 %1909, %v343_v48   ;;  %478 = vperm.xlu1 %1910, %v344_v51  }
  0x4f   : > { %623 = vperm.xlu0 %1909, %v373_v52   ;;  %628 = vperm.xlu1 %1910, %v374_v53  }
  0x50   : > { %1844 = vmatmul.mubr.msk.bf16.gmra.mxu0 %vm880_vm1, %v1925_v49  ;;  %1865 = vmatmul.mubr.msk.bf16.gmra.mxu1 %vm880_vm1, %v1926_v50  ;;  %v1940_v49 = vld [vmem:[%s2920_s1 + $0x90] sm:$0xff]  }
  0x51   : > { %1096 = vmatprep.mubr.bf16.mxu0 %v1977_v0  ;;  %1306 = vmatprep.mubr.bf16.mxu1 %v1977_v0 }
  0x53   : > { %613 = vperm.xlu0 %1909, %v371_v54   ;;  %618 = vperm.xlu1 %1910, %v372_v57   ;;  %v1941_v54 = vld [vmem:[%s2920_s1 + $0x98] sm:$0xff]  }
  0x57   : > { %603 = vperm.xlu0 %1909, %v369_v58   ;;  %608 = vperm.xlu1 %1910, %v370_v59   ;;  %v1942_v59 = vld [vmem:[%s2920_s1 + $0xa0] sm:$0xff]  }
  0x58   : > { %1845 = vmatmul.mubr.msk.bf16.gmra.mxu0 %vm880_vm1, %v1927_v55  ;;  %1866 = vmatmul.mubr.msk.bf16.gmra.mxu1 %vm880_vm1, %v1928_v56 }
  0x59   : > { %1106 = vmatprep.mubr.bf16.mxu0 %v1977_v0  ;;  %1316 = vmatprep.mubr.bf16.mxu1 %v1977_v0 }
  0x5b   : > { %593 = vperm.xlu0 %1909, %v367_v60   ;;  %598 = vperm.xlu1 %1910, %v368_v63  }
  0x5f   : > { %583 = vperm.xlu0 %1909, %v365_v1   ;;  %588 = vperm.xlu1 %1910, %v366_v2  }
  0x60   : > { %1846 = vmatmul.mubr.msk.bf16.gmra.mxu0 %vm880_vm1, %v1929_v61  ;;  %1867 = vmatmul.mubr.msk.bf16.gmra.mxu1 %vm880_vm1, %v1930_v62 }
  0x61   : > { %1116 = vmatprep.mubr.bf16.mxu0 %v1977_v0  ;;  %1326 = vmatprep.mubr.bf16.mxu1 %v1977_v0 }
  0x63   : > { %573 = vperm.xlu0 %1909, %v363_v3   ;;  %578 = vperm.xlu1 %1910, %v364_v6  }
  0x67   : > { %563 = vperm.xlu0 %1909, %v361_v7   ;;  %568 = vperm.xlu1 %1910, %v362_v8  }
  0x68   : > { %1847 = vmatmul.mubr.msk.bf16.gmra.mxu0 %vm880_vm1, %v1931_v4  ;;  %1868 = vmatmul.mubr.msk.bf16.gmra.mxu1 %vm880_vm1, %v1932_v5 }
  0x69   : > { %1126 = vmatprep.mubr.bf16.mxu0 %v1977_v0 }
  0x6b   : > { %553 = vperm.xlu0 %1909, %v359_v9   ;;  %558 = vperm.xlu1 %1910, %v360_v11  }
  0x6f   : > { %703 = vperm.xlu0 %1909, %v389_v12   ;;  %708 = vperm.xlu1 %1910, %v390_v13  }
  0x70   : > { %1848 = vmatmul.mubr.msk.bf16.gmra.mxu0 %vm880_vm1, %v1933_v10 }
  0x71   : > { %1136 = vmatprep.mubr.bf16.mxu0 %v1977_v0 }
  0x73   : > { %693 = vperm.xlu0 %1909, %v387_v14   ;;  %698 = vperm.xlu1 %1910, %v388_v16  }
  0x77   : > { %683 = vperm.xlu0 %1909, %v385_v17   ;;  %688 = vperm.xlu1 %1910, %v386_v18  }
  0x78   : > { %1849 = vmatmul.mubr.msk.bf16.gmra.mxu0 %vm880_vm1, %v1934_v15 }
  0x79   : > { %1146 = vmatprep.mubr.bf16.mxu0 %v1977_v0 }
  0x7b   : > { %673 = vperm.xlu0 %1909, %v383_v19   ;;  %678 = vperm.xlu1 %1910, %v384_v21  }
  0x7f   : > { %663 = vperm.xlu0 %1909, %v381_v22   ;;  %668 = vperm.xlu1 %1910, %v382_v23  }
  0x80   : > { %1850 = vmatmul.mubr.msk.bf16.gmra.mxu0 %vm880_vm1, %v1935_v20 }
  0x81   : > { %1156 = vmatprep.mubr.bf16.mxu0 %v1977_v0 }
  0x83   : > { %653 = vperm.xlu0 %1909, %v379_v24   ;;  %658 = vperm.xlu1 %1910, %v380_v26  }
  0x87   : > { %643 = vperm.xlu0 %1909, %v377_v27   ;;  %648 = vperm.xlu1 %1910, %v378_v28  }
  0x88   : > { %1851 = vmatmul.mubr.msk.bf16.gmra.mxu0 %vm880_vm1, %v1936_v25 }
  0x89   : > { %1166 = vmatprep.mubr.bf16.mxu0 %v1977_v0 }
  0x8a   : > { %v2352_v29 = vpop.permute.xlu0 %463  ;;  %v2363_v33 = vpop.permute.xlu1 %453 }
  0x8b   : > { %633 = vperm.xlu0 %1909, %v375_v30   ;;  %638 = vperm.xlu1 %1910, %v376_v32  }
  0x8e   : > { %v2373_v36 = vpop.permute.xlu0 %468  ;;  %v2375_v37 = vpop.permute.xlu1 %458 }
  0x8f   : > { %1540 = vperm.xlu0 %1909, %v1535_v34   ;;  %1545 = vperm.xlu1 %1910, %v1536_v35  }
  0x90   : > { %1852 = vmatmul.mubr.msk.bf16.gmra.mxu0 %vm880_vm1, %v1937_v31 }
  0x91   : > { %1176 = vmatprep.mubr.bf16.mxu0 %v1977_v0 }
  0x92   : > { %v2383_v40 = vpop.permute.xlu0 %443  ;;  %v2385_v41 = vpop.permute.xlu1 %448 }
  0x93   : > { %1550 = vperm.xlu0 %1909, %v1537_v38  }
  0x96   : > { %v2389_v42 = vpop.permute.xlu0 %433  ;;  %v2391_v43 = vpop.permute.xlu1 %438 }
  0x98   : > { %1853 = vmatmul.mubr.msk.bf16.gmra.mxu0 %vm880_vm1, %v1938_v39 }
  0x99   : > { %1186 = vmatprep.mubr.bf16.mxu0 %v1977_v0 }
  0x9a   : > { %v2396_v45 = vpop.permute.xlu0 %423  ;;  %v2398_v46 = vpop.permute.xlu1 %428 }
  0x9e   : > { %v2402_v47 = vpop.permute.xlu0 %413  ;;  %v2404_v48 = vpop.permute.xlu1 %418 }
  0xa0   : > { %1854 = vmatmul.mubr.msk.bf16.gmra.mxu0 %vm880_vm1, %v1939_v44 }
  0xa1   : > { %1196 = vmatprep.mubr.bf16.mxu0 %v1977_v0 }
  0xa2   : > { %v2409_v50 = vpop.permute.xlu0 %403  ;;  %v2411_v51 = vpop.permute.xlu1 %408 }
  0xa6   : > { %v394_v52 = vpop.permute.xlu0 %393  ;;  %v399_v53 = vpop.permute.xlu1 %398 }
  0xa8   : > { %1855 = vmatmul.mubr.msk.bf16.gmra.mxu0 %vm880_vm1, %v1940_v49 }
  0xa9   : > { %1206 = vmatprep.mubr.bf16.mxu0 %v1977_v0 }
  0xaa   : > { %v2418_v55 = vpop.permute.xlu0 %543  ;;  %v2420_v56 = vpop.permute.xlu1 %548 }
  0xab   : > { %2965 = vst [vmem:[#allocation2_spill] sm:$0xff] %v2418_v55  ;;  %2966 = vst [vmem:[#allocation3_spill] sm:$0xff] %v2420_v56 }
  0xae   : > { %v2424_v57 = vpop.permute.xlu0 %533  ;;  %v2426_v58 = vpop.permute.xlu1 %538 }
  0xaf   : > { %2967 = vst [vmem:[#allocation4_spill] sm:$0xff] %v2424_v57  ;;  %2968 = vst [vmem:[#allocation5_spill] sm:$0xff] %v2426_v58 }
  0xb0   : > { %1856 = vmatmul.mubr.msk.bf16.gmra.mxu0 %vm880_vm1, %v1941_v54 }
  0xb1   : > { %1216 = vmatprep.mubr.bf16.mxu0 %v1977_v0 }
  0xb2   : > { %v2431_v60 = vpop.permute.xlu0 %523  ;;  %v2433_v61 = vpop.permute.xlu1 %528 }
  0xb3   : > { %2969 = vst [vmem:[#allocation6_spill] sm:$0xff] %v2431_v60  ;;  %2970 = vst [vmem:[#allocation7_spill] sm:$0xff] %v2433_v61 }
  0xb6   : > { %v2436_v62 = vpop.permute.xlu0 %513  ;;  %v2438_v63 = vpop.permute.xlu1 %518 }
  0xb7   : > { %2971 = vst [vmem:[#allocation8_spill] sm:$0xff] %v2436_v62  ;;  %2972 = vst [vmem:[#allocation9_spill] sm:$0xff] %v2438_v63 }
  0xb8   : > { %1857 = vmatmul.mubr.msk.bf16.gmra.mxu0 %vm880_vm1, %v1942_v59 }
  0xba   : > { %v2440_v1 = vpop.permute.xlu0 %503  ;;  %v2442_v0 = vpop.permute.xlu1 %508 }
  0xbb   : > { %2973 = vst [vmem:[#allocation10_spill] sm:$0xff] %v2440_v1  ;;  %2974 = vst [vmem:[#allocation11_spill] sm:$0xff] %v2442_v0 }
  0xbe   : > { %v2444_v2 = vpop.permute.xlu0 %493  ;;  %v2446_v3 = vpop.permute.xlu1 %498 }
  0xbf   : > { %2975 = vst [vmem:[#allocation12_spill] sm:$0xff] %v2444_v2  ;;  %2976 = vst [vmem:[#allocation13_spill] sm:$0xff] %v2446_v3 }
  0xc2   : > { %v2448_v4 = vpop.permute.xlu0 %483  ;;  %v2450_v5 = vpop.permute.xlu1 %488 }
  0xc6   : > { %v2452_v6 = vpop.permute.xlu0 %473  ;;  %v2454_v7 = vpop.permute.xlu1 %478 }
  0xca   : > { %v2456_v8 = vpop.permute.xlu0 %623  ;;  %v2458_v9 = vpop.permute.xlu1 %628 }
  0xcb   : > { %2977 = vst [vmem:[#allocation14_spill] sm:$0xff] %v2456_v8  ;;  %2978 = vst [vmem:[#allocation15_spill] sm:$0xff] %v2458_v9 }
  0xce   : > { %v2460_v10 = vpop.permute.xlu0 %613  ;;  %v2462_v11 = vpop.permute.xlu1 %618 }
  0xcf   : > { %2979 = vst [vmem:[#allocation16_spill] sm:$0xff] %v2460_v10  ;;  %2980 = vst [vmem:[#allocation17_spill] sm:$0xff] %v2462_v11 }
  0xd2   : > { %v2464_v12 = vpop.permute.xlu0 %603  ;;  %v2466_v13 = vpop.permute.xlu1 %608 }
  0xd3   : > { %2981 = vst [vmem:[#allocation18_spill] sm:$0xff] %v2464_v12  ;;  %2982 = vst [vmem:[#allocation19_spill] sm:$0xff] %v2466_v13 }
  0xd6   : > { %v2470_v16 = vpop.permute.xlu0 %593  ;;  %v2474_v20 = vpop.permute.xlu1 %598 }
  0xd7   : > { %2984 = vst [vmem:[#allocation21_spill] sm:$0xff] %v2470_v16  ;;  %2986 = vst [vmem:[#allocation23_spill] sm:$0xff] %v2474_v20 }
  0xd8   : > { %v1018_v14 = vpop.f32.mrf.mxu0  ;;  %v2468_v15 = vpop.f32.mrf.mxu1 }
  0xd9   : > { %2983 = vst [vmem:[#allocation20_spill] sm:$0xff] %v2468_v15  ;;  %v1019_v19 = vadd.f32 %v1018_v14, %v394_v52 }
  0xda   : > { %v1020_v17 = vpop.f32.mrf.mxu0  ;;  %v2472_v18 = vpop.f32.mrf.mxu1 }
  0xdb   : > { %2985 = vst [vmem:[#allocation22_spill] sm:$0xff] %v2472_v18  ;;  %v1021_v23 = vadd.f32 %v1020_v17, %v394_v52  ;;  %v2478_v25 = vpop.permute.xlu0 %583  ;;  %v1337_v28 = vmax.f32 %v1019_v19, 0.0  ;;  %v2482_v32 = vpop.permute.xlu1 %588 }
  0xdc   : > { %v1022_v21 = vpop.f32.mrf.mxu0  ;;  %v2476_v22 = vpop.f32.mrf.mxu1  ;;  %2988 = vst [vmem:[#allocation25_spill] sm:$0xff] %v2478_v25  ;;  %2990 = vst [vmem:[#allocation27_spill] sm:$0xff] %v2482_v32 }
  0xdd   : > { %2987 = vst [vmem:[#allocation24_spill] sm:$0xff] %v2476_v22  ;;  %v1023_v24 = vadd.f32 %v1022_v21, %v399_v53  ;;  %v1338_v38 = vmax.f32 %v1021_v23, 0.0 }
  0xde   : > { %v1024_v26 = vpop.f32.mrf.mxu0  ;;  %v2480_v27 = vpop.f32.mrf.mxu1 }
  0xdf   : > { %2989 = vst [vmem:[#allocation26_spill] sm:$0xff] %v2480_v27  ;;  %v1339_v30 = vmax.f32 %v1023_v24, 0.0  ;;  %v1025_v31 = vadd.f32 %v1024_v26, %v399_v53  ;;  %v2488_v49 = vpop.permute.xlu0 %573  ;;  %v2495_v17 = vpop.permute.xlu1 %578 }
  0xe0   : > { %v1028_v34 = vpop.f32.mrf.mxu0  ;;  %v2484_v35 = vpop.f32.mrf.mxu1  ;;  %2993 = vst [vmem:[#allocation30_spill] sm:$0xff] %v2488_v49  ;;  %2996 = vst [vmem:[#allocation33_spill] sm:$0xff] %v2495_v17 }
  0xe1   : > { %2991 = vst [vmem:[#allocation28_spill] sm:$0xff] %v2484_v35  ;;  %v2486_v39 = vpack.c.bf16 %v1339_v30, %v1337_v28  ;;  %v1340_v44 = vmax.f32 %v1025_v31, 0.0  ;;  %v1029_v14 = vadd.f32 %v1028_v34, %v2409_v50 }
  0xe2   : > { %v1030_v52 = vpop.f32.mrf.mxu0  ;;  %v2490_v54 = vpop.f32.mrf.mxu1 }
  0xe3   : > { %2992 = vst [vmem:[#allocation29_spill] sm:$0xff] %v2486_v39  ;;  %2994 = vst [vmem:[#allocation31_spill] sm:$0xff] %v2490_v54  ;;  %v2492_v59 = vpack.c.bf16 %v1340_v44, %v1338_v38  ;;  %v1031_v21 = vadd.f32 %v1030_v52, %v2409_v50  ;;  %v2501_v24 = vpop.permute.xlu0 %563  ;;  %v1341_v30 = vmax.f32 %v1029_v14, 0.0  ;;  %v2506_v44 = vpop.permute.xlu1 %568 }
  0xe4   : > { %v1032_v53 = vpop.f32.mrf.mxu0  ;;  %v2497_v19 = vpop.f32.mrf.mxu1  ;;  %2998 = vst [vmem:[#allocation35_spill] sm:$0xff] %v2501_v24  ;;  %3000 = vst [vmem:[#allocation37_spill] sm:$0xff] %v2506_v44 }
  0xe5   : > { %2995 = vst [vmem:[#allocation32_spill] sm:$0xff] %v2492_v59  ;;  %2997 = vst [vmem:[#allocation34_spill] sm:$0xff] %v2497_v19  ;;  %v1033_v23 = vadd.f32 %v1032_v53, %v2411_v51  ;;  %v1342_v17 = vmax.f32 %v1031_v21, 0.0 }
  0xe6   : > { %v1034_v26 = vpop.f32.mrf.mxu0  ;;  %v2503_v28 = vpop.f32.mrf.mxu1 }
  0xe7   : > { %2999 = vst [vmem:[#allocation36_spill] sm:$0xff] %v2503_v28  ;;  %v1343_v31 = vmax.f32 %v1033_v23, 0.0  ;;  %v1035_v38 = vadd.f32 %v1034_v26, %v2411_v51  ;;  %v2514_v52 = vpop.permute.xlu0 %553  ;;  %v2522_v23 = vpop.permute.xlu1 %558 }
  0xe8   : > { %v2508_v34 = vpop.f32.mrf.mxu0  ;;  %v2510_v49 = vpop.f32.mrf.mxu1  ;;  %3003 = vst [vmem:[#allocation40_spill] sm:$0xff] %v2514_v52  ;;  %3006 = vst [vmem:[#allocation43_spill] sm:$0xff] %v2522_v23 }
  0xe9   : > { %3001 = vst [vmem:[#allocation38_spill] sm:$0xff] %v2510_v49  ;;  %v2512_v25 = vpack.c.bf16 %v1343_v31, %v1341_v30  ;;  %v1344_v50 = vmax.f32 %v1035_v38, 0.0 }
  0xea   : > { %v2516_v53 = vpop.f32.mrf.mxu0  ;;  %v2518_v24 = vpop.f32.mrf.mxu1 }
  0xeb   : > { %3002 = vst [vmem:[#allocation39_spill] sm:$0xff] %v2512_v25  ;;  %3004 = vst [vmem:[#allocation41_spill] sm:$0xff] %v2518_v24  ;;  %v2520_v14 = vpack.c.bf16 %v1344_v50, %v1342_v17  ;;  %v2528_v44 = vpop.permute.xlu0 %703  ;;  %v2534_v31 = vpop.permute.xlu1 %708 }
  0xec   : > { %v2524_v51 = vpop.f32.mrf.mxu0  ;;  %v2526_v26 = vpop.f32.mrf.mxu1  ;;  %3008 = vst [vmem:[#allocation45_spill] sm:$0xff] %v2528_v44  ;;  %3010 = vst [vmem:[#allocation47_spill] sm:$0xff] %v2534_v31 }
  0xed   : > { %3005 = vst [vmem:[#allocation42_spill] sm:$0xff] %v2520_v14  ;;  %3007 = vst [vmem:[#allocation44_spill] sm:$0xff] %v2526_v26 }
  0xee   : > { %v2530_v21 = vpop.f32.mrf.mxu0  ;;  %v2532_v30 = vpop.f32.mrf.mxu1 }
  0xef   : > { %3009 = vst [vmem:[#allocation46_spill] sm:$0xff] %v2532_v30  ;;  %v2538_v32 = vpop.permute.xlu0 %693  ;;  %v2542_v23 = vpop.permute.xlu1 %698 }
  0xf0   : > { %v2536_v38 = vpop.f32.mrf.mxu0  ;;  %v1258_v52 = vpop.f32.mrf.mxu1  ;;  %3011 = vst [vmem:[#allocation48_spill] sm:$0xff] %v2538_v32  ;;  %3012 = vst [vmem:[#allocation49_spill] sm:$0xff] %v2542_v23  ;;  %v1945_v23 = vld [vmem:[%s2922_s3 + $0x4] ss:$16 sps:$4 sm:$0xff]  }
  0xf1   : > { %1619 = vmatprep.mubr.bf16.mxu1 %v1945_v23 }
  0xf2   : > { %v2540_v17 = vpop.f32.mrf.mxu0  ;;  %v1260_v50 = vpop.f32.mrf.mxu1 }
  0xf3   : > { %v2546_v44 = vpop.permute.xlu0 %683  ;;  %v2550_v27 = vpop.permute.xlu1 %688 }
  0xf4   : > { %v2544_v20 = vpop.f32.mrf.mxu0  ;;  %v1262_v16 = vpop.f32.mrf.mxu1  ;;  %3013 = vst [vmem:[#allocation50_spill] sm:$0xff] %v2546_v44  ;;  %3014 = vst [vmem:[#allocation51_spill] sm:$0xff] %v2550_v27 }
  0xf6   : > { %v2548_v22 = vpop.f32.mrf.mxu0  ;;  %v1264_v15 = vpop.f32.mrf.mxu1 }
  0xf7   : > { %v2554_v19 = vpop.permute.xlu0 %673  ;;  %v2558_v18 = vpop.permute.xlu1 %678 }
  0xf8   : > { %v2552_v31 = vpop.f32.mrf.mxu0  ;;  %v1268_v13 = vpop.f32.mrf.mxu1  ;;  %3015 = vst [vmem:[#allocation52_spill] sm:$0xff] %v2554_v19  ;;  %3016 = vst [vmem:[#allocation53_spill] sm:$0xff] %v2558_v18 }
  0xfa   : > { %v2556_v32 = vpop.f32.mrf.mxu0  ;;  %v1270_v35 = vpop.f32.mrf.mxu1 }
  0xfb   : > { %v2565_v28 = vpop.permute.xlu0 %663  ;;  %v2569_v54 = vpop.permute.xlu1 %668 }
  0xfc   : > { %v2563_v44 = vpop.f32.mrf.mxu0  ;;  %v1272_v12 = vpop.f32.mrf.mxu1  ;;  %3017 = vst [vmem:[#allocation54_spill] sm:$0xff] %v2565_v28  ;;  %3018 = vst [vmem:[#allocation55_spill] sm:$0xff] %v2569_v54 }
  0xfe   : > { %v2567_v27 = vpop.f32.mrf.mxu0  ;;  %v1274_v11 = vpop.f32.mrf.mxu1 }
  0xff   : > { %v2573_v26 = vpop.permute.xlu0 %653  ;;  %v2578_v9 = vpop.permute.xlu1 %658 }
 0x100   : > { %v2571_v19 = vpop.f32.mrf.mxu0  ;;  %v1278_v10 = vpop.f32.mrf.mxu1  ;;  %3019 = vst [vmem:[#allocation56_spill] sm:$0xff] %v2573_v26  ;;  %3021 = vst [vmem:[#allocation58_spill] sm:$0xff] %v2578_v9 }
 0x101   : > { %v1279_v30 = vadd.f32 %v1278_v10, %v2573_v26 }
 0x102   : > { %v1070_v18 = vpop.f32.mrf.mxu0  ;;  %v2575_v49 = vpop.f32.mrf.mxu1 }
 0x103   : > { %3020 = vst [vmem:[#allocation57_spill] sm:$0xff] %v2575_v49  ;;  %v644_v23 = vpop.permute.xlu0 %643  ;;  %v1441_v3 = vmax.f32 %v1279_v30, 0.0  ;;  %v649_v0 = vpop.permute.xlu1 %648 }
 0x104   : > { %v1072_v24 = vpop.f32.mrf.mxu0  ;;  %v1282_v28 = vpop.f32.mrf.mxu1  ;;  %v1269_v54 = vadd.f32 %v1268_v13, %v644_v23  ;;  %v1271_v63 = vadd.f32 %v1270_v35, %v644_v23  ;;  %v1273_v60 = vadd.f32 %v1272_v12, %v649_v0  ;;  %v1275_v55 = vadd.f32 %v1274_v11, %v649_v0 }
 0x105   : > { %v1283_v8 = vadd.f32 %v1282_v28, %v2578_v9 }
 0x106   : > { %v1074_v2 = vpop.f32.mrf.mxu0  ;;  %v1437_v61 = vmax.f32 %v1269_v54, 0.0  ;;  %v1438_v59 = vmax.f32 %v1271_v63, 0.0  ;;  %v1439_v28 = vmax.f32 %v1273_v60, 0.0 }
 0x107   : > { %v1443_v1 = vmax.f32 %v1283_v8, 0.0  ;;  %v634_v57 = vpop.permute.xlu0 %633  ;;  %v639_v58 = vpop.permute.xlu1 %638  ;;  %v1440_v8 = vmax.f32 %v1275_v55, 0.0 }
 0x108   : > { %v1078_v62 = vpop.f32.mrf.mxu0  ;;  %v1259_v10 = vadd.f32 %v1258_v52, %v634_v57  ;;  %v1261_v26 = vadd.f32 %v1260_v50, %v634_v57  ;;  %v2583_v25 = vpack.c.bf16 %v1439_v28, %v1437_v61  ;;  %v1263_v35 = vadd.f32 %v1262_v16, %v639_v58 }
 0x109   : > { %v2581_v56 = vpack.c.bf16 %v1443_v1, %v1441_v3  ;;  %v1265_v12 = vadd.f32 %v1264_v15, %v639_v58  ;;  %v2585_v1 = vpack.c.bf16 %v1440_v8, %v1438_v59  ;;  %v1079_v28 = vadd.f32 %v1078_v62, %v2363_v33 }
 0x10a   : > { %v1080_v49 = vpop.f32.mrf.mxu0  ;;  %v1433_v9 = vmax.f32 %v1259_v10, 0.0  ;;  %v1434_v30 = vmax.f32 %v1261_v26, 0.0  ;;  %3022 = vst [vmem:[#allocation59_spill] sm:$0xff] %v2583_v25  ;;  %v1435_v23 = vmax.f32 %v1263_v35, 0.0 }
 0x10b   : > { %v1436_v14 = vmax.f32 %v1265_v12, 0.0  ;;  %3023 = vst [vmem:[#allocation60_spill] sm:$0xff] %v2585_v1  ;;  %v1081_v15 = vadd.f32 %v1080_v49, %v2363_v33 }
 0x10c   : > { %v1082_v39 = vpop.f32.mrf.mxu0  ;;  %v2587_v57 = vpack.c.bf16 %v1435_v23, %v1433_v9 }
 0x10d   : > { %v2589_v0 = vpack.c.bf16 %v1436_v14, %v1434_v30  ;;  %v1083_v59 = vadd.f32 %v1082_v39, %v2375_v37  ;;  %v1075_v14 = vadd.f32 %v1074_v2, %v2385_v41  ;;  %v1362_v8 = vmax.f32 %v1081_v15, 0.0 }
 0x10e   : > { %v1084_v13 = vpop.f32.mrf.mxu0  ;;  %3024 = vst [vmem:[#allocation61_spill] sm:$0xff] %v2587_v57 }
 0x10f   : > { %3025 = vst [vmem:[#allocation62_spill] sm:$0xff] %v2589_v0  ;;  %v1085_v60 = vadd.f32 %v1084_v13, %v2375_v37  ;;  %v1073_v37 = vadd.f32 %v1072_v24, %v2385_v41  ;;  %v1363_v39 = vmax.f32 %v1083_v59, 0.0  ;;  %v1361_v41 = vmax.f32 %v1079_v28, 0.0 }
 0x110   : > { %v1088_v54 = vpop.f32.mrf.mxu0 }
 0x111   : > { %v1089_v61 = vadd.f32 %v1088_v54, %v2352_v29  ;;  %v1364_v26 = vmax.f32 %v1085_v60, 0.0  ;;  %v1360_v54 = vmax.f32 %v1075_v14, 0.0 }
 0x112   : > { %v1090_v3 = vpop.f32.mrf.mxu0 }
 0x113   : > { %v1091_v11 = vadd.f32 %v1090_v3, %v2352_v29  ;;  %v1365_v30 = vmax.f32 %v1089_v61, 0.0  ;;  %v1071_v29 = vadd.f32 %v1070_v18, %v2383_v40  ;;  %v1484_v23 = vpack.c.bf16 %v1364_v26, %v1362_v8 }
 0x114   : > { %v1092_v63 = vpop.f32.mrf.mxu0  ;;  %v1055_v18 = vadd.f32 %v2548_v22, %v2398_v46  ;;  %v1061_v3 = vadd.f32 %v2556_v32, %v2389_v42  ;;  %v1359_v22 = vmax.f32 %v1073_v37, 0.0  ;;  %v1045_v26 = vadd.f32 %v2530_v21, %v2404_v48 }
 0x115   : > { %v1093_v55 = vadd.f32 %v1092_v63, %v2373_v36  ;;  %v1366_v50 = vmax.f32 %v1091_v11, 0.0  ;;  %v1358_v63 = vmax.f32 %v1071_v29, 0.0  ;;  %v1041_v29 = vadd.f32 %v2516_v53, %v2402_v47 }
 0x116   : > { %v1094_v58 = vpop.f32.mrf.mxu0  ;;  %v1354_v14 = vmax.f32 %v1061_v3, 0.0  ;;  %v1352_v28 = vmax.f32 %v1055_v18, 0.0  ;;  %v1049_v8 = vadd.f32 %v2536_v38, %v2396_v45  ;;  %v1348_v37 = vmax.f32 %v1045_v26, 0.0 }
 0x117   : > { %v1095_v16 = vadd.f32 %v1094_v58, %v2373_v36  ;;  %v1367_v9 = vmax.f32 %v1093_v55, 0.0  ;;  %v1065_v36 = vadd.f32 %v2567_v27, %v2391_v43  ;;  %v1069_v27 = vadd.f32 %v2571_v19, %v2383_v40 }
 0x118   : > { %v1098_v52 = vpop.f32.mrf.mxu0  ;;  %v1063_v55 = vadd.f32 %v2563_v44, %v2391_v43  ;;  %v1483_v58 = vpack.c.bf16 %v1363_v39, %v1361_v41  ;;  %v1482_v32 = vpack.c.bf16 %v1360_v54, %v1358_v63  ;;  %v1059_v19 = vadd.f32 %v2552_v31, %v2389_v42 }
 0x119   : > { %v1368_v10 = vmax.f32 %v1095_v16, 0.0  ;;  %v1099_v49 = vadd.f32 %v1098_v52, %v2452_v6  ;;  %v1485_v2 = vpack.c.bf16 %v1367_v9, %v1365_v30  ;;  %v1356_v61 = vmax.f32 %v1065_v36, 0.0 }
 0x11a   : > { %v1100_v13 = vpop.f32.mrf.mxu0  ;;  %v1357_v9 = vmax.f32 %v1069_v27, 0.0 }
 0x11b   : > { %v1486_v35 = vpack.c.bf16 %v1368_v10, %v1366_v50  ;;  %v1101_v33 = vadd.f32 %v1100_v13, %v2452_v6  ;;  %v1369_v60 = vmax.f32 %v1099_v49, 0.0  ;;  %v1053_v50 = vadd.f32 %v2544_v20, %v2398_v46 }
 0x11c   : > { %v1102_v12 = vpop.f32.mrf.mxu0  ;;  %v1355_v10 = vmax.f32 %v1063_v55, 0.0  ;;  %v1481_v42 = vpack.c.bf16 %v1359_v22, %v1357_v9  ;;  %v1480_v30 = vpack.c.bf16 %v1356_v61, %v1354_v14  ;;  %v3027_v55 = vld [vmem:[#allocation39_spill] sm:$0xff]  ;;  %v3028_v61 = vld [vmem:[#allocation32_spill] sm:$0xff] }
 0x11d   : > { %v1103_v62 = vadd.f32 %v1102_v12, %v2454_v7  ;;  %1587 = vmatprep.subr.bf16.mxu1 %v1486_v35  ;;  %v1370_v16 = vmax.f32 %v1101_v33, 0.0  ;;  %v1353_v35 = vmax.f32 %v1059_v19, 0.0  ;;  %v1351_v39 = vmax.f32 %v1053_v50, 0.0 }
 0x11e   : > { %v1104_v24 = vpop.f32.mrf.mxu0  ;;  %1588 = vmatpush1.bf16.msra.mxu1 %v1485_v2  ;;  %v1349_v33 = vmax.f32 %v1049_v8, 0.0  ;;  %v3030_v8 = vld [vmem:[#allocation5_spill] sm:$0xff] }
 0x11f   : > { %v1371_v11 = vmax.f32 %v1103_v62, 0.0  ;;  %v1105_v6 = vadd.f32 %v1104_v24, %v2454_v7  ;;  %1589 = vmatprep.subr.bf16.mxu1 %v1484_v23  ;;  %v1051_v7 = vadd.f32 %v2540_v17, %v2396_v45  ;;  %v1479_v2 = vpack.c.bf16 %v1355_v10, %v1353_v35 }
 0x120   : > { %v1108_v15 = vpop.f32.mrf.mxu0  ;;  %v1039_v23 = vadd.f32 %v2508_v34, %v2402_v47 }
 0x121   : > { %v2616_v59 = vpack.c.bf16 %v1371_v11, %v1369_v60  ;;  %v1372_v40 = vmax.f32 %v1105_v6, 0.0  ;;  %v1109_v44 = vadd.f32 %v1108_v15, %v2448_v4  ;;  %v1350_v49 = vmax.f32 %v1051_v7, 0.0  ;;  %v3026_v60 = vld [vmem:[#allocation42_spill] sm:$0xff]  ;;  %v3029_v15 = vld [vmem:[#allocation29_spill] sm:$0xff] }
 0x122   : > { %v1110_v52 = vpop.f32.mrf.mxu0  ;;  %1590 = vmatpush1.bf16.msra.mxu1 %v1483_v58  ;;  %v1345_v41 = vmax.f32 %v1039_v23, 0.0 }
 0x123   : > { %v2622_v43 = vpack.c.bf16 %v1372_v40, %v1370_v16  ;;  %1591 = vmatprep.subr.bf16.mxu1 %v1482_v32  ;;  %v1111_v13 = vadd.f32 %v1110_v52, %v2448_v4  ;;  %v1373_v46 = vmax.f32 %v1109_v44, 0.0  ;;  %v1043_v4 = vadd.f32 %v2524_v51, %v2404_v48  ;;  %v2666_v16 = vpop.f32.mrf.mxu1 }
 0x124   : > { %v1112_v31 = vpop.f32.mrf.mxu0  ;;  %v1478_v53 = vpack.c.bf16 %v1352_v28, %v1350_v49  ;;  %v1477_v51 = vpack.c.bf16 %v1351_v39, %v1349_v33  ;;  %v3033_v39 = vld [vmem:[#allocation4_spill] sm:$0xff]  ;;  %v3034_v33 = vld [vmem:[#allocation7_spill] sm:$0xff] }
 0x125   : > { %v1113_v17 = vadd.f32 %v1112_v31, %v2450_v5  ;;  %v1374_v54 = vmax.f32 %v1111_v13, 0.0  ;;  %v1347_v48 = vmax.f32 %v1043_v4, 0.0  ;;  %v2668_v9 = vpop.f32.mrf.mxu1 }
 0x126   : > { %v1114_v21 = vpop.f32.mrf.mxu0  ;;  %1592 = vmatpush1.bf16.msra.mxu1 %v1481_v42 }
 0x127   : > { %v1375_v20 = vmax.f32 %v1113_v17, 0.0  ;;  %v1115_v36 = vadd.f32 %v1114_v21, %v2450_v5  ;;  %1593 = vmatprep.subr.bf16.mxu1 %v1480_v30  ;;  %v1346_v5 = vmax.f32 %v1041_v29, 0.0  ;;  %v1475_v63 = vpack.c.bf16 %v1347_v48, %v1345_v41  ;;  %v2670_v14 = vpop.f32.mrf.mxu1  ;;  %v3031_v21 = vld [vmem:[#allocation2_spill] sm:$0xff] }
 0x128   : > { %v2638_v12 = vpop.f32.mrf.mxu0 }
 0x129   : > { %v2640_v45 = vpack.c.bf16 %v1375_v20, %v1373_v46  ;;  %v1376_v38 = vmax.f32 %v1115_v36, 0.0  ;;  %v1476_v27 = vpack.c.bf16 %v1348_v37, %v1346_v5  ;;  %v2672_v50 = vpop.f32.mrf.mxu1  ;;  %v3032_v46 = vld [vmem:[#allocation3_spill] sm:$0xff] }
 0x12a   : > { %v2644_v62 = vpop.f32.mrf.mxu0  ;;  %1594 = vmatpush1.bf16.msra.mxu1 %v1479_v2 }
 0x12b   : > { %v2646_v18 = vpack.c.bf16 %v1376_v38, %v1374_v54  ;;  %1595 = vmatprep.subr.bf16.mxu1 %v1478_v53  ;;  %v2674_v31 = vpop.f32.mrf.mxu1 }
 0x12c   : > { %v2648_v3 = vpop.f32.mrf.mxu0 }
 0x12d   : > { %v2676_v13 = vpop.f32.mrf.mxu1 }
 0x12e   : > { %v2650_v24 = vpop.f32.mrf.mxu0  ;;  %1596 = vmatpush1.bf16.msra.mxu1 %v1477_v51 }
 0x12f   : > { %1597 = vmatprep.subr.bf16.mxu1 %v1476_v27  ;;  %v2681_v36 = vpop.f32.mrf.mxu1 }
 0x130   : > { %v2652_v47 = vpop.f32.mrf.mxu0 }
 0x131   : > { %v2690_v41 = vpop.f32.mrf.mxu1 }
 0x132   : > { %v2654_v34 = vpop.f32.mrf.mxu0  ;;  %1598 = vmatpush1.bf16.msra.mxu1 %v1475_v63 }
 0x133   : > { %1599 = vmatprep.subr.bf16.mxu1 %v3026_v60 }
 0x134   : > { %v2657_v11 = vpop.f32.mrf.mxu0 }
 0x136   : > { %v2659_v6 = vpop.f32.mrf.mxu0  ;;  %1600 = vmatpush1.bf16.msra.mxu1 %v3027_v55 }
 0x137   : > { %1601 = vmatprep.subr.bf16.mxu1 %v3028_v61  ;;  %v3035_v61 = vld [vmem:[#allocation6_spill] sm:$0xff] }
 0x138   : > { %v2663_v22 = vpop.f32.mrf.mxu0 }
 0x13a   : > { %v1140_v58 = vpop.f32.mrf.mxu0  ;;  %1602 = vmatpush1.bf16.msra.mxu1 %v3029_v15 }
 0x13c   : > { %v1142_v32 = vpop.f32.mrf.mxu0 }
 0x13e   : > { %v1144_v40 = vpop.f32.mrf.mxu0 }
 0x140   : > { %v1148_v19 = vpop.f32.mrf.mxu0 }
 0x142   : > { %v1150_v52 = vpop.f32.mrf.mxu0 }
 0x143   : > { %v1151_v15 = vadd.f32 %v1150_v52, %v3035_v61  ;;  %v3037_v52 = vld [vmem:[#allocation8_spill] sm:$0xff] }
 0x144   : > { %v1152_v7 = vpop.f32.mrf.mxu0 }
 0x146   : > { %v1154_v44 = vpop.f32.mrf.mxu0 }
 0x147   : > { %v1155_v5 = vadd.f32 %v1154_v44, %v3034_v33  ;;  %v3036_v44 = vld [vmem:[#allocation9_spill] sm:$0xff] }
 0x148   : > { %v1158_v26 = vpop.f32.mrf.mxu0 }
 0x149   : > { %v1159_v63 = vadd.f32 %v1158_v26, %v3033_v39  ;;  %v1149_v26 = vadd.f32 %v1148_v19, %v3035_v61 }
 0x14a   : > { %v1160_v10 = vpop.f32.mrf.mxu0 }
 0x14b   : > { %v1161_v2 = vadd.f32 %v1160_v10, %v3033_v39 }
 0x14c   : > { %v1162_v42 = vpop.f32.mrf.mxu0 }
 0x14d   : > { %v1163_v54 = vadd.f32 %v1162_v42, %v3030_v8  ;;  %v1394_v10 = vmax.f32 %v1161_v2, 0.0  ;;  %v1153_v42 = vadd.f32 %v1152_v7, %v3034_v33  ;;  %v1390_v7 = vmax.f32 %v1151_v15, 0.0  ;;  %v3040_v15 = vld [vmem:[#allocation13_spill] sm:$0xff] }
 0x14e   : > { %v1164_v28 = vpop.f32.mrf.mxu0 }
 0x14f   : > { %v1165_v35 = vadd.f32 %v1164_v28, %v3030_v8  ;;  %v1145_v8 = vadd.f32 %v1144_v40, %v3036_v44  ;;  %v1391_v39 = vmax.f32 %v1153_v42, 0.0 }
 0x150   : > { %v1168_v30 = vpop.f32.mrf.mxu0 }
 0x151   : > { %v1169_v4 = vadd.f32 %v1168_v30, %v3031_v21  ;;  %v1396_v48 = vmax.f32 %v1165_v35, 0.0  ;;  %v1395_v30 = vmax.f32 %v1163_v54, 0.0  ;;  %v1392_v35 = vmax.f32 %v1155_v5, 0.0 }
 0x152   : > { %v1170_v17 = vpop.f32.mrf.mxu0  ;;  %v1139_v5 = vadd.f32 %v2663_v22, %v3037_v52 }
 0x153   : > { %v1171_v49 = vadd.f32 %v1170_v17, %v3031_v21  ;;  %v1397_v60 = vmax.f32 %v1169_v4, 0.0  ;;  %v1500_v21 = vpack.c.bf16 %v1396_v48, %v1394_v10  ;;  %v1141_v4 = vadd.f32 %v1140_v58, %v3037_v52 }
 0x154   : > { %v1172_v29 = vpop.f32.mrf.mxu0  ;;  %v1498_v33 = vpack.c.bf16 %v1392_v35, %v1390_v7  ;;  %v1389_v48 = vmax.f32 %v1149_v26, 0.0  ;;  %v1125_v10 = vadd.f32 %v2650_v24, %v3040_v15  ;;  %v1123_v35 = vadd.f32 %v2648_v3, %v3040_v15 }
 0x155   : > { %v1173_v20 = vadd.f32 %v1172_v29, %v3032_v46  ;;  %v1398_v51 = vmax.f32 %v1171_v49, 0.0  ;;  %v2700_v49 = vpop.f32.mrf.mxu1 }
 0x156   : > { %v1174_v37 = vpop.f32.mrf.mxu0 }
 0x157   : > { %v1175_v53 = vadd.f32 %v1174_v37, %v3032_v46  ;;  %v1399_v38 = vmax.f32 %v1173_v20, 0.0  ;;  %v1393_v46 = vmax.f32 %v1159_v63, 0.0  ;;  %v1143_v37 = vadd.f32 %v1142_v32, %v3036_v44  ;;  %v2711_v19 = vpop.f32.mrf.mxu1  ;;  %v3041_v44 = vld [vmem:[#allocation12_spill] sm:$0xff] }
 0x158   : > { %v2687_v23 = vpop.f32.mrf.mxu0 }
 0x159   : > { %v1400_v27 = vmax.f32 %v1175_v53, 0.0  ;;  %v1501_v17 = vpack.c.bf16 %v1399_v38, %v1397_v60  ;;  %v1499_v2 = vpack.c.bf16 %v1395_v30, %v1393_v46  ;;  %v3038_v53 = vld [vmem:[#allocation11_spill] sm:$0xff]  ;;  %v1388_v38 = vmax.f32 %v1145_v8, 0.0  ;;  %v2725_v42 = vpop.f32.mrf.mxu1 }
 0x15a   : > { %v2693_v55 = vpop.f32.mrf.mxu0  ;;  %v1135_v54 = vadd.f32 %v2659_v6, %v3038_v53  ;;  %v1133_v63 = vadd.f32 %v2657_v11, %v3038_v53  ;;  %v1387_v6 = vmax.f32 %v1143_v37, 0.0  ;;  %v1497_v60 = vpack.c.bf16 %v1391_v39, %v1389_v48  ;;  %v3042_v48 = vld [vmem:[#allocation14_spill] sm:$0xff] }
 0x15b   : > { %v1502_v28 = vpack.c.bf16 %v1400_v27, %v1398_v51  ;;  %v3039_v51 = vld [vmem:[#allocation10_spill] sm:$0xff]  ;;  %v1386_v27 = vmax.f32 %v1141_v4, 0.0  ;;  %v1121_v11 = vadd.f32 %v2644_v62, %v3041_v44  ;;  %v1380_v46 = vmax.f32 %v1125_v10, 0.0  ;;  %v2737_v4 = vpop.f32.mrf.mxu1 }
 0x15c   : > { %v2697_v29 = vpop.f32.mrf.mxu0  ;;  %v1131_v32 = vadd.f32 %v2654_v34, %v3039_v51  ;;  %v1384_v22 = vmax.f32 %v1135_v54, 0.0  ;;  %v1129_v30 = vadd.f32 %v2652_v47, %v3039_v51  ;;  %v1385_v34 = vmax.f32 %v1139_v5, 0.0  ;;  %v3043_v51 = vld [vmem:[#allocation41_spill] sm:$0xff]  ;;  %v3046_v10 = vld [vmem:[#allocation38_spill] sm:$0xff] }
 0x15d   : > { %1603 = vmatprep.subr.bf16.mxu1 %v1502_v28  ;;  %v1496_v28 = vpack.c.bf16 %v1388_v38, %v1386_v27  ;;  %v1383_v24 = vmax.f32 %v1133_v63, 0.0  ;;  %v1119_v47 = vadd.f32 %v2638_v12, %v3041_v44  ;;  %v1378_v62 = vmax.f32 %v1121_v11, 0.0  ;;  %v2745_v54 = vpop.f32.mrf.mxu1  ;;  %v3044_v27 = vld [vmem:[#allocation15_spill] sm:$0xff]  ;;  %v3045_v63 = vld [vmem:[#allocation46_spill] sm:$0xff]  ;;  %v3048_v44 = vld [vmem:[#allocation16_spill] sm:$0xff] }
 0x15e   : > { %v2703_v20 = vpop.f32.mrf.mxu0  ;;  %1604 = vmatpush2.bf16.msra.mxu1 %v1501_v17  ;;  %v1382_v8 = vmax.f32 %v1131_v32, 0.0  ;;  %v1381_v7 = vmax.f32 %v1129_v30, 0.0  ;;  %v1379_v39 = vmax.f32 %v1123_v35, 0.0  ;;  %v1251_v32 = vadd.f32 %v3043_v51, %v3042_v48  ;;  %v3049_v11 = vld [vmem:[#allocation31_spill] sm:$0xff]  ;;  %v3055_v51 = vld [vmem:[#allocation34_spill] sm:$0xff] }
 0x15f   : > { %1605 = vmatprep.subr.bf16.mxu1 %v1500_v21  ;;  %v1495_v21 = vpack.c.bf16 %v1387_v6, %v1385_v34  ;;  %v1492_v53 = vpack.c.bf16 %v1380_v46, %v1378_v62  ;;  %v1377_v38 = vmax.f32 %v1119_v47, 0.0  ;;  %v1255_v6 = vadd.f32 %v3045_v63, %v3044_v27  ;;  %v3053_v62 = vld [vmem:[#allocation22_spill] sm:$0xff] }
 0x160   : > { %v2707_v40 = vpop.f32.mrf.mxu0  ;;  %v1494_v52 = vpack.c.bf16 %v1384_v22, %v1382_v8  ;;  %v1249_v22 = vadd.f32 %v3046_v10, %v3042_v48  ;;  %v1241_v8 = vadd.f32 %v3049_v11, %v3048_v44  ;;  %v1430_v35 = vmax.f32 %v1251_v32, 0.0  ;;  %v3056_v10 = vld [vmem:[#allocation19_spill] sm:$0xff] }
 0x161   : > { %v1491_v5 = vpack.c.bf16 %v1379_v39, %v1377_v38 }
 0x162   : > { %v2715_v58 = vpop.f32.mrf.mxu0  ;;  %1606 = vmatpush2.bf16.msra.mxu1 %v1499_v2  ;;  %v1493_v2 = vpack.c.bf16 %v1383_v24, %v1381_v7  ;;  %v3050_v24 = vld [vmem:[#allocation17_spill] sm:$0xff]  ;;  %v1426_v63 = vmax.f32 %v1241_v8, 0.0 }
 0x163   : > { %1607 = vmatprep.subr.bf16.mxu1 %v1498_v33  ;;  %v1243_v32 = vadd.f32 %v3055_v51, %v3050_v24 }
 0x164   : > { %v2721_v61 = vpop.f32.mrf.mxu0 }
 0x166   : > { %v2729_v17 = vpop.f32.mrf.mxu0  ;;  %1608 = vmatpush2.bf16.msra.mxu1 %v1497_v60  ;;  %v2755_v60 = vpop.f32.mrf.mxu1 }
 0x167   : > { %1609 = vmatprep.subr.bf16.mxu1 %v1496_v28  ;;  %v3047_v28 = vld [vmem:[#allocation44_spill] sm:$0xff] }
 0x168   : > { %v2735_v26 = vpop.f32.mrf.mxu0  ;;  %v1253_v30 = vadd.f32 %v3047_v28, %v3044_v27  ;;  %v2766_v47 = vpop.f32.mrf.mxu1  ;;  %v3057_v28 = vld [vmem:[#allocation26_spill] sm:$0xff] }
 0x169   : > { %v1235_v11 = vadd.f32 %v3057_v28, %v3056_v10 }
 0x16a   : > { %v2741_v37 = vpop.f32.mrf.mxu0  ;;  %1610 = vmatpush2.bf16.msra.mxu1 %v1495_v21  ;;  %v3051_v21 = vld [vmem:[#allocation36_spill] sm:$0xff]  ;;  %v1431_v48 = vmax.f32 %v1253_v30, 0.0 }
 0x16b   : > { %1611 = vmatprep.subr.bf16.mxu1 %v1494_v52  ;;  %v1245_v46 = vadd.f32 %v3051_v21, %v3050_v24  ;;  %v1432_v52 = vmax.f32 %v1255_v6, 0.0  ;;  %v2784_v21 = vpop.f32.mrf.mxu1  ;;  %v3058_v30 = vld [vmem:[#allocation20_spill] sm:$0xff]  ;;  %v1424_v28 = vmax.f32 %v1235_v11, 0.0 }
 0x16c   : > { %v2743_v3 = vpop.f32.mrf.mxu0 }
 0x16d   : > { %v1518_v6 = vpack.c.bf16 %v1432_v52, %v1430_v35  ;;  %v1427_v35 = vmax.f32 %v1243_v32, 0.0  ;;  %v2791_v0 = vpop.f32.mrf.mxu1 }
 0x16e   : > { %v2747_v33 = vpop.f32.mrf.mxu0  ;;  %1612 = vmatpush2.bf16.msra.mxu1 %v1493_v2  ;;  %v1469_v2 = vld [vmem:[%s2922_s3 + $0x20] sm:$0xff] }
 0x16f   : > { %1613 = vmatprep.subr.bf16.mxu1 %v1492_v53  ;;  %v3054_v53 = vld [vmem:[#allocation28_spill] sm:$0xff] }
 0x170   : > { %v2749_v12 = vpop.f32.mrf.mxu0  ;;  %v1239_v38 = vadd.f32 %v3054_v53, %v3048_v44 }
 0x172   : > { %v1210_v15 = vpop.f32.mrf.mxu0  ;;  %1614 = vmatpush2.bf16.msra.mxu1 %v1491_v5  ;;  %v1429_v5 = vmax.f32 %v1249_v22, 0.0  ;;  %v1874_v22 = vcombine.high %v1469_v2, %v1469_v2  ;;  %v1425_v8 = vmax.f32 %v1239_v38, 0.0 }
 0x173   : > { %1615 = vmatprep.subr.bf16.mxu1 %v2646_v18  ;;  %v3052_v18 = vld [vmem:[#allocation18_spill] sm:$0xff] }
 0x174   : > { %v1212_v34 = vpop.f32.mrf.mxu0  ;;  %v1231_v39 = vadd.f32 %v3053_v62, %v3052_v18  ;;  %v1229_v44 = vadd.f32 %v3058_v30, %v3052_v18  ;;  %v1517_v24 = vpack.c.bf16 %v1431_v48, %v1429_v5  ;;  %v3061_v18 = vld [vmem:[#allocation23_spill] sm:$0xff]  ;;  %v1515_v5 = vpack.c.bf16 %v1427_v35, %v1425_v8 }
 0x176   : > { %v1214_v7 = vpop.f32.mrf.mxu0  ;;  %1616 = vmatpush2.bf16.msra.mxu1 %v2640_v45  ;;  %v1428_v45 = vmax.f32 %v1245_v46, 0.0  ;;  %v3059_v46 = vld [vmem:[#allocation24_spill] sm:$0xff]  ;;  %v1422_v51 = vmax.f32 %v1231_v39, 0.0  ;;  %v1421_v38 = vmax.f32 %v1229_v44, 0.0 }
 0x177   : > { %1617 = vmatprep.subr.bf16.mxu1 %v2622_v43  ;;  %v1943_v43 = vld [vmem:[%s2922_s3] ss:$16 sps:$4 sm:$0xff]   ;;  %v1233_v52 = vadd.f32 %v3059_v46, %v3056_v10  ;;  %v3062_v10 = vld [vmem:[#allocation27_spill] sm:$0xff] }
 0x178   : > { %v1218_v27 = vpop.f32.mrf.mxu0  ;;  %v1516_v57 = vpack.c.bf16 %v1428_v45, %v1426_v63  ;;  %v1215_v39 = vadd.f32 %v1214_v7, %v3062_v10  ;;  %v1873_v63 = vcombine.low %v1469_v2, %v1469_v2  ;;  %v1328_v45 = vpop.f32.mrf.mxu1  ;;  %v1213_v8 = vadd.f32 %v1212_v34, %v3062_v10  ;;  %v3064_v7 = vld [vmem:[#allocation33_spill] sm:$0xff] }
 0x179   : > { %v1423_v48 = vmax.f32 %v1233_v52, 0.0  ;;  %v1205_v35 = vadd.f32 %v2747_v33, %v3064_v7  ;;  %v1203_v34 = vadd.f32 %v2743_v3, %v3064_v7  ;;  %v3071_v7 = vld [vmem:[#allocation47_spill] sm:$0xff] }
 0x17a   : > { %v1220_v62 = vpop.f32.mrf.mxu0  ;;  %1618 = vmatpush2.bf16.msra.mxu1 %v2616_v59  ;;  %v3060_v59 = vld [vmem:[#allocation21_spill] sm:$0xff]  ;;  %v1416_v2 = vmax.f32 %v1215_v39, 0.0 }
 0x17b   : > { %1638 = vmatprep.subr.bf16.mxu1 %v1518_v6  ;;  %v1221_v1 = vadd.f32 %v1220_v62, %v3060_v59  ;;  %v1219_v30 = vadd.f32 %v1218_v27, %v3060_v59  ;;  %v1950_v62 = vld [vmem:[%s2922_s3 + $0xc] ss:$16 sps:$4 sm:$0xff]   ;;  %v1513_v44 = vpack.c.bf16 %v1423_v48, %v1421_v38  ;;  %v1330_v27 = vpop.f32.mrf.mxu1  ;;  %v1411_v39 = vmax.f32 %v1203_v34, 0.0 }
 0x17c   : > { %v1222_v53 = vpop.f32.mrf.mxu0  ;;  %v3066_v59 = vld [vmem:[#allocation37_spill] sm:$0xff] }
 0x17d   : > { %1620 = vmatmul.mubr.bf16.vlgmr.msra.gmra.mxu1 %v1943_v43  ;;  %v1223_v32 = vadd.f32 %v1222_v53, %v3061_v18  ;;  %v1514_v43 = vpack.c.bf16 %v1424_v28, %v1422_v51  ;;  %v1417_v53 = vmax.f32 %v1219_v30, 0.0  ;;  %v1415_v28 = vmax.f32 %v1213_v8, 0.0  ;;  %v3073_v34 = vld [vmem:[#allocation49_spill] sm:$0xff] }
 0x17e   : > { %v1224_v25 = vpop.f32.mrf.mxu0  ;;  %1639 = vmatpush1.bf16.msra.mxu1 %v1517_v24  ;;  %1629 = vmatprep.mubr.bf16.mxu1 %v1874_v22  ;;  %v1418_v22 = vmax.f32 %v1221_v1, 0.0  ;;  %v1193_v3 = vadd.f32 %v2721_v61, %v3066_v59 }
 0x17f   : > { %v1225_v6 = vadd.f32 %v1224_v25, %v3061_v18  ;;  %1640 = vmatprep.subr.bf16.mxu1 %v1516_v57  ;;  %v3063_v25 = vld [vmem:[#allocation25_spill] sm:$0xff]  ;;  %v1419_v24 = vmax.f32 %v1223_v32, 0.0  ;;  %v1195_v18 = vadd.f32 %v2729_v17, %v3066_v59  ;;  %v3067_v32 = vld [vmem:[#allocation35_spill] sm:$0xff] }
 0x180   : > { %v1211_v57 = vadd.f32 %v1210_v15, %v3063_v25  ;;  %v1209_v52 = vadd.f32 %v2749_v12, %v3063_v25  ;;  %v3065_v15 = vld [vmem:[#allocation30_spill] sm:$0xff] }
 0x181   : > { %v1420_v11 = vmax.f32 %v1225_v6, 0.0  ;;  %v1201_v1 = vadd.f32 %v2741_v37, %v3065_v15  ;;  %v1511_v33 = vpack.c.bf16 %v1419_v24, %v1417_v53  ;;  %v1412_v6 = vmax.f32 %v1205_v35, 0.0  ;;  %v3070_v24 = vld [vmem:[#allocation45_spill] sm:$0xff]  ;;  %v3072_v53 = vld [vmem:[#allocation48_spill] sm:$0xff] }
 0x182   : > { %1641 = vmatpush1.bf16.msra.mxu1 %v1515_v5  ;;  %v1414_v51 = vmax.f32 %v1211_v57, 0.0  ;;  %v1332_v5 = vpop.f32.mrf.mxu1  ;;  %v1199_v12 = vadd.f32 %v2735_v26, %v3065_v15  ;;  %v1413_v48 = vmax.f32 %v1209_v52, 0.0  ;;  %v1191_v37 = vadd.f32 %v2715_v58, %v3067_v32  ;;  %v3069_v57 = vld [vmem:[#allocation40_spill] sm:$0xff] }
 0x183   : > { %1642 = vmatprep.subr.bf16.mxu1 %v1514_v43  ;;  %v1512_v46 = vpack.c.bf16 %v1420_v11, %v1418_v22  ;;  %v1410_v10 = vmax.f32 %v1201_v1, 0.0  ;;  %v3068_v43 = vld [vmem:[#allocation43_spill] sm:$0xff]  ;;  %v1189_v26 = vadd.f32 %v2707_v40, %v3067_v32  ;;  %v1181_v58 = vadd.f32 %v2693_v55, %v3069_v57 }
 0x184   : > { %v1510_v38 = vpack.c.bf16 %v1416_v2, %v1414_v51  ;;  %v1509_v11 = vpack.c.bf16 %v1415_v28, %v1413_v48  ;;  %v1185_v17 = vadd.f32 %v2703_v20, %v3068_v43  ;;  %v1409_v25 = vmax.f32 %v1199_v12, 0.0  ;;  %v3075_v32 = vld [vmem:[#allocation51_spill] sm:$0xff] }
 0x185   : > { %1630 = vmatmul.mubr.bf16.gmra.mxu1 %v1873_v63  ;;  %v1408_v63 = vmax.f32 %v1195_v18, 0.0  ;;  %v1508_v30 = vpack.c.bf16 %v1412_v6, %v1410_v10  ;;  %v1406_v22 = vmax.f32 %v1191_v37, 0.0  ;;  %v1183_v61 = vadd.f32 %v2697_v29, %v3068_v43  ;;  %v3074_v6 = vld [vmem:[#allocation50_spill] sm:$0xff] }
 0x186   : > { %1643 = vmatpush1.bf16.msra.mxu1 %v1513_v44  ;;  %1670 = vmatprep.mubr.bf16.mxu1 %v1950_v62  ;;  %v1334_v62 = vpop.f32.mrf.mxu1  ;;  %v1407_v44 = vmax.f32 %v1193_v3, 0.0  ;;  %v1507_v8 = vpack.c.bf16 %v1411_v39, %v1409_v25  ;;  %v1331_v20 = vadd.f32 %v1330_v27, %v3070_v24  ;;  %v1404_v2 = vmax.f32 %v1185_v17, 0.0  ;;  %v3076_v39 = vld [vmem:[#allocation52_spill] sm:$0xff]  ;;  %v3078_v25 = vld [vmem:[#allocation54_spill] sm:$0xff] }
 0x187   : > { %1644 = vmatprep.subr.bf16.mxu1 %v1512_v46  ;;  %v1335_v35 = vadd.f32 %v1334_v62, %v3071_v7  ;;  %v1506_v46 = vpack.c.bf16 %v1408_v63, %v1406_v22  ;;  %v1179_v40 = vadd.f32 %v2687_v23, %v3069_v57  ;;  %v1405_v52 = vmax.f32 %v1189_v26, 0.0  ;;  %v3077_v63 = vld [vmem:[#allocation53_spill] sm:$0xff] }
 0x188   : > { %v1321_v55 = vadd.f32 %v2766_v47, %v3072_v53  ;;  %v1402_v15 = vmax.f32 %v1181_v58, 0.0  ;;  %v1329_v29 = vadd.f32 %v1328_v45, %v3070_v24  ;;  %v1333_v1 = vadd.f32 %v1332_v5, %v3071_v7  ;;  %v3081_v7 = vld [vmem:[#allocation57_spill] sm:$0xff] }
 0x189   : > { %v1403_v51 = vmax.f32 %v1183_v61, 0.0  ;;  %v1505_v27 = vpack.c.bf16 %v1407_v44, %v1405_v52  ;;  %v1325_v28 = vadd.f32 %v2791_v0, %v3073_v34  ;;  %v1464_v59 = vmax.f32 %v1335_v35, 0.0 }
 0x18a   : > { %1645 = vmatpush1.bf16.msra.mxu1 %v1511_v33  ;;  %v1462_v33 = vmax.f32 %v1331_v20, 0.0  ;;  %v1504_v18 = vpack.c.bf16 %v1404_v2, %v1402_v15  ;;  %v1401_v23 = vmax.f32 %v1179_v40, 0.0  ;;  %v1319_v47 = vadd.f32 %v2755_v60, %v3072_v53  ;;  %v3080_v20 = vld [vmem:[#allocation56_spill] sm:$0xff] }
 0x18b   : > { %1646 = vmatprep.subr.bf16.mxu1 %v1510_v38  ;;  %v1311_v38 = vadd.f32 %v2725_v42, %v3074_v6  ;;  %v1323_v45 = vadd.f32 %v2784_v21, %v3073_v34  ;;  %v1461_v5 = vmax.f32 %v1329_v29, 0.0  ;;  %v1463_v12 = vmax.f32 %v1333_v1, 0.0 }
 0x18c   : > { %v1503_v48 = vpack.c.bf16 %v1403_v51, %v1401_v23  ;;  %v1315_v0 = vadd.f32 %v2745_v54, %v3075_v32  ;;  %v1458_v37 = vmax.f32 %v1321_v55, 0.0  ;;  %v1460_v10 = vmax.f32 %v1325_v28, 0.0  ;;  %v3082_v55 = vld [vmem:[#allocation58_spill] sm:$0xff]  ;;  %v3083_v28 = vld [vmem:[#allocation60_spill] sm:$0xff]  ;;  %v3086_v23 = vld [vmem:[#allocation61_spill] sm:$0xff] }
 0x18d   : > { %v1534_v3 = vpack.c.bf16 %v1464_v59, %v1462_v33  ;;  %v1301_v42 = vadd.f32 %v2681_v36, %v3076_v39  ;;  %v1309_v60 = vadd.f32 %v2711_v19, %v3074_v6  ;;  %v1313_v21 = vadd.f32 %v2737_v4, %v3075_v32  ;;  %v3085_v33 = vld [vmem:[#allocation62_spill] sm:$0xff]  ;;  %v1470_v59 = vld [vmem:[%s2922_s3 + $0x28] sm:$0xff] }
 0x18e   : > { %1647 = vmatpush1.bf16.msra.mxu1 %v1509_v11  ;;  %v1457_v11 = vmax.f32 %v1319_v47, 0.0  ;;  %v1459_v43 = vmax.f32 %v1323_v45, 0.0  ;;  %v1533_v17 = vpack.c.bf16 %v1463_v12, %v1461_v5  ;;  %v1305_v54 = vadd.f32 %v2700_v49, %v3077_v63  ;;  %v3079_v49 = vld [vmem:[#allocation55_spill] sm:$0xff] }
 0x18f   : > { %1648 = vmatprep.subr.bf16.mxu1 %v1508_v30  ;;  %v1454_v30 = vmax.f32 %v1311_v38, 0.0  ;;  %v1456_v62 = vmax.f32 %v1315_v0, 0.0  ;;  %v1532_v26 = vpack.c.bf16 %v1460_v10, %v1458_v37  ;;  %v1299_v36 = vadd.f32 %v2676_v13, %v3076_v39  ;;  %v1541_v10 = vpop.permute.xlu0 %1540 }
 0x190   : > { %v1291_v19 = vadd.f32 %v2670_v14, %v3078_v25  ;;  %v1303_v4 = vadd.f32 %v2690_v41, %v3077_v63  ;;  %v1453_v57 = vmax.f32 %v1309_v60, 0.0  ;;  %v1455_v58 = vmax.f32 %v1313_v21, 0.0  ;;  %v1546_v21 = vpop.permute.xlu1 %1545 }
 0x191   : > { %v1531_v22 = vpack.c.bf16 %v1459_v43, %v1457_v11  ;;  %v1450_v61 = vmax.f32 %v1301_v42, 0.0  ;;  %v1452_v44 = vmax.f32 %v1305_v54, 0.0  ;;  %v1530_v24 = vpack.c.bf16 %v1456_v62, %v1454_v30 }
 0x192   : > { %1649 = vmatpush1.bf16.msra.mxu1 %v1507_v8  ;;  %v1295_v8 = vadd.f32 %v2674_v31, %v3079_v49  ;;  %v1289_v13 = vadd.f32 %v2668_v9, %v3078_v25  ;;  %v1281_v14 = vadd.f32 %v3081_v7, %v3080_v20  ;;  %v1449_v35 = vmax.f32 %v1299_v36, 0.0 }
 0x193   : > { %1650 = vmatprep.subr.bf16.mxu1 %v1506_v46  ;;  %v1451_v2 = vmax.f32 %v1303_v4, 0.0  ;;  %v1293_v41 = vadd.f32 %v2672_v50, %v3079_v49  ;;  %v1529_v46 = vpack.c.bf16 %v1455_v58, %v1453_v57  ;;  %v1446_v40 = vmax.f32 %v1291_v19, 0.0  ;;  %v1551_v36 = vpop.permute.xlu0 %1550 }
 0x194   : > { %v1528_v52 = vpack.c.bf16 %v1452_v44, %v1450_v61  ;;  %v1448_v53 = vmax.f32 %v1295_v8, 0.0  ;;  %v1285_v31 = vadd.f32 %v2666_v16, %v3082_v55  ;;  %v1445_v15 = vmax.f32 %v1289_v13, 0.0  ;;  %v3084_v16 = vld [vmem:[#allocation59_spill] sm:$0xff] }
 0x195   : > { %v1527_v9 = vpack.c.bf16 %v1451_v2, %v1449_v35  ;;  %v1447_v29 = vmax.f32 %v1293_v41, 0.0  ;;  %v1442_v1 = vmax.f32 %v1281_v14, 0.0  ;;  %v1876_v6 = vcombine.high %v1470_v59, %v1470_v59 }
 0x196   : > { %1651 = vmatpush1.bf16.msra.mxu1 %v1505_v27  ;;  %v1444_v51 = vmax.f32 %v1285_v31, 0.0  ;;  %v1526_v27 = vpack.c.bf16 %v1448_v53, %v1446_v40  ;;  %v1978_v38 = vmov 0.0  }
 0x197   : > { %1652 = vmatprep.subr.bf16.mxu1 %v1504_v18  ;;  %v1525_v34 = vpack.c.bf16 %v1447_v29, %v1445_v15  ;;  %v1948_v18 = vld [vmem:[%s2922_s3 + $0x8] ss:$16 sps:$4 sm:$0xff]   ;;  %259 = vst.msk [vmem:[%s2884_s29] sm:$0xff] %vm258_vm2, %v1978_v38  ;;  %260 = vst.msk [vmem:[%s2884_s29 + $0x8] sm:$0xff] %vm258_vm2, %v1978_v38 }
 0x198   : > { %v1524_v50 = vpack.c.bf16 %v1444_v51, %v1442_v1  ;;  %261 = vst.msk [vmem:[%s2884_s29 + $0x10] sm:$0xff] %vm258_vm2, %v1978_v38 }
 0x19a   : > { %1653 = vmatpush1.bf16.msra.mxu1 %v1503_v48 }
 0x19b   : > { %1654 = vmatprep.subr.bf16.mxu1 %v1534_v3 }
 0x19e   : > { %1655 = vmatpush2.bf16.msra.mxu1 %v1533_v17  ;;  %v1695_v41 = vld [vmem:[%s2884_s29] sm:$0xff] }
 0x19f   : > { %1656 = vmatprep.subr.bf16.mxu1 %v1532_v26  ;;  %v1697_v31 = vld [vmem:[%s2884_s29 + $0x10] sm:$0xff] }
 0x1a2   : > { %1657 = vmatpush2.bf16.msra.mxu1 %v1531_v22 }
 0x1a3   : > { %1658 = vmatprep.subr.bf16.mxu1 %v1530_v24 }
 0x1a6   : > { %1659 = vmatpush2.bf16.msra.mxu1 %v1529_v46 }
 0x1a7   : > { %1660 = vmatprep.subr.bf16.mxu1 %v1528_v52  ;;  %v1696_v52 = vld [vmem:[%s2884_s29 + $0x8] sm:$0xff] }
 0x1aa   : > { %1661 = vmatpush2.bf16.msra.mxu1 %v1527_v9 }
 0x1ab   : > { %1662 = vmatprep.subr.bf16.mxu1 %v1526_v27 }
 0x1ae   : > { %1663 = vmatpush2.bf16.msra.mxu1 %v1525_v34 }
 0x1af   : > { %1664 = vmatprep.subr.bf16.mxu1 %v1524_v50 }
 0x1b2   : > { %1665 = vmatpush2.bf16.msra.mxu1 %v2581_v56  ;;  %v1875_v56 = vcombine.low %v1470_v59, %v1470_v59 }
 0x1b3   : > { %1666 = vmatprep.subr.bf16.mxu1 %v3083_v28 }
 0x1b6   : > { %1667 = vmatpush2.bf16.msra.mxu1 %v3084_v16 }
 0x1b7   : > { %1668 = vmatprep.subr.bf16.mxu1 %v3085_v33 }
 0x1ba   : > { %1669 = vmatpush2.bf16.msra.mxu1 %v3086_v23 }
 0x1bd   : > { %1671 = vmatmul.mubr.bf16.vlgmr.msra.gmra.mxu1 %v1948_v18 }
 0x1be   : > { %1680 = vmatprep.mubr.bf16.mxu1 %v1876_v6 }
 0x1c5   : > { %1681 = vmatmul.mubr.bf16.gmra.mxu1 %v1875_v56 }
 0x23d   : > { %v1621_v47 = vpop.f32.mrf.mxu1 }
 0x23e   : > { %v1622_v3 = vadd.f32 %v1621_v47, %v1541_v10 }
 0x23f   : > { %v1623_v45 = vpop.f32.mrf.mxu1 }
 0x240   : > { %v1624_v42 = vadd.f32 %v1623_v45, %v1541_v10 }
 0x241   : > { %v1625_v5 = vpop.f32.mrf.mxu1 }
 0x242   : > { %v1626_v43 = vadd.f32 %v1625_v5, %v1546_v21 }
 0x243   : > { %v1627_v12 = vpop.f32.mrf.mxu1 }
 0x244   : > { %v1628_v54 = vadd.f32 %v1627_v12, %v1546_v21 }
 0x245   : > { %v1631_v48 = vpop.f32.mrf.mxu1 }
 0x246   : > { %v1632_v19 = vadd.f32 %v1631_v48, %v1551_v36 }
 0x247   : > { %v1633_v32 = vpop.f32.mrf.mxu1 }
 0x248   : > { %v1634_v22 = vadd.f32 %v1633_v32, %v1551_v36 }
 0x249   : > { %v1635_v0 = vpop.f32.mrf.mxu1 }
 0x24b   : > { %v1636_v37 = vpop.f32.mrf.mxu1 }
 0x27d   : > { %v1672_v39 = vpop.f32.mrf.mxu1 }
 0x27e   : > { %v1673_v60 = vadd.f32 %v1672_v39, %v1622_v3 }
 0x27f   : > { %v1674_v11 = vpop.f32.mrf.mxu1 }
 0x280   : > { %v1675_v17 = vadd.f32 %v1674_v11, %v1624_v42  ;;  %v1689_v30 = vmax.f32 %v1673_v60, 0.0 }
 0x281   : > { %v1676_v63 = vpop.f32.mrf.mxu1 }
 0x282   : > { %v1690_v62 = vmax.f32 %v1675_v17, 0.0  ;;  %v1677_v26 = vadd.f32 %v1676_v63, %v1626_v43 }
 0x283   : > { %v1678_v25 = vpop.f32.mrf.mxu1 }
 0x284   : > { %v1679_v4 = vadd.f32 %v1678_v25, %v1628_v54  ;;  %v1698_v57 = vadd.f32 %v1690_v62, %v1689_v30  ;;  %v1691_v61 = vmax.f32 %v1677_v26, 0.0 }
 0x285   : > { %v1682_v58 = vpop.f32.mrf.mxu1 }
 0x286   : > { %v1692_v44 = vmax.f32 %v1679_v4, 0.0  ;;  %v1683_v49 = vadd.f32 %v1682_v58, %v1632_v19  ;;  %1699 = vadd.xlane.f32.xlu1 %v1698_v57 }
 0x287   : > { %v1684_v8 = vpop.f32.mrf.mxu1 }
 0x288   : > { %v1685_v24 = vadd.f32 %v1684_v8, %v1634_v22  ;;  %v1701_v13 = vadd.f32 %v1692_v44, %v1691_v61  ;;  %v1693_v7 = vmax.f32 %v1683_v49, 0.0 }
 0x289   : > { %v1686_v20 = vpop.f32.mrf.mxu1 }
 0x28a   : > { %v1694_v14 = vmax.f32 %v1685_v24, 0.0  ;;  %1702 = vadd.xlane.f32.xlu0 %v1701_v13 }
 0x28b   : > { %v1687_v35 = vpop.f32.mrf.mxu1 }
 0x28c   : > { %v1704_v2 = vadd.f32 %v1694_v14, %v1693_v7 }
 0x28e   : > { %1705 = vadd.xlane.f32.xlu0 %v1704_v2 }
 0x30f   : > { %v1700_v46 = vpop.xlane.xlu1 %1699 }
 0x310   : > { %v1707_v40 = vadd.f32 %v1700_v46, %v1695_v41 }
 0x312   : > { %1711 = vst.msk [vmem:[%s2884_s29] sm:$0xff] %vm258_vm2, %v1707_v40 }
 0x313   : > { %v1703_v53 = vpop.xlane.xlu0 %1702 }
 0x314   : > { %v1708_v55 = vadd.f32 %v1703_v53, %v1696_v52 }
 0x316   : > { %1712 = vst.msk [vmem:[%s2884_s29 + $0x8] sm:$0xff] %vm258_vm2, %v1708_v55 }
 0x317   : > { %v1706_v15 = vpop.xlane.xlu0 %1705 }
 0x318   : > { %v1709_v9 = vadd.f32 %v1706_v15, %v1697_v31 }
 0x319   : > { %v1717_v29 = vld [vmem:[%s2884_s29] sm:$0xff] }
 0x31a   : > { %v1720_v1 = vmul.f32 0.00390625, %v1717_v29  ;;  %1713 = vst.msk [vmem:[%s2884_s29 + $0x10] sm:$0xff] %vm258_vm2, %v1709_v9 }
 0x31c   : > { %1723 = vst.msk [vmem:[%s2884_s29] sm:$0xff] %vm258_vm2, %v1720_v1 }
 0x31d   : > { %v1718_v51 = vld [vmem:[%s2884_s29 + $0x8] sm:$0xff] }
 0x31e   : > { %v1721_v27 = vmul.f32 0.00390625, %v1718_v51 }
 0x320   : > { %1724 = vst.msk [vmem:[%s2884_s29 + $0x8] sm:$0xff] %vm258_vm2, %v1721_v27 }
 0x321   : > { %v1719_v34 = vld [vmem:[%s2884_s29 + $0x10] sm:$0xff] }
 0x322   : > { %v1722_v50 = vmul.f32 0.00390625, %v1719_v34 }
 0x324   : > { %1725 = vst.msk [vmem:[%s2884_s29 + $0x10] sm:$0xff] %vm258_vm2, %v1722_v50 }
 0x325 PF: > { %s15_s20 = sadd.s32 1, %s1975_s20   ;;  %s3087_s18 = smov %s1971_s19 }
 0x326   : > { %p12_p5 = scmp.ge.s32.totalorder %s15_s20, 4   ;;  %s3088_s19 = smov %s3090_s21 }
 0x328   :  { %14 = sbr.rel (!%p12_p5) target bundleno = 2 (0x2), region = 78 }

</bundles_post_ra>
